<compile_context>
chip_gen: v7x
topology: tpu7x:2x2x1
jax: 0.10.0
libtpu: 0.0.40
codegen_flags: <defaults>
</compile_context>

<pallas_src>
import functools

import jax
import jax.numpy as jnp
import numpy as np
from jax.experimental import pallas as pl
from jax.experimental.pallas import tpu as pltpu

LANES = 128


def _round_up(x, m):
    return (x + m - 1) // m * m


# ----------------------------- fused kernel --------------------------------

def _fused_kernel(p_ref, w1_ref, b1_ref, mask_ref, w2_ref, b2_ref,
                  wc_ref, bc_ref, o_ref, a2_ref):
    """conv1(+ReLU, emitted in conv2 tap layout) -> conv2(+ReLU) -> GAP -> Linear."""
    m = p_ref.shape[0]                      # m = block_b * (h2*w2)
    hw, kc = mask_ref.shape                 # h2*w2, 9*c1
    blk_b = m // hw

    # ---- conv1: one dot; output lanes are (di, dj, c1) == conv2's K layout ----
    a1 = jnp.dot(p_ref[...], w1_ref[...],
                 preferred_element_type=jnp.float32)              # (m, kc) f32
    a1 = jnp.maximum(a1 + b1_ref[...], 0.0)
    # zero the entries that correspond to conv2's zero-padding border
    a1 = (a1.reshape(blk_b, hw, kc) * mask_ref[...][None]).reshape(m, kc)
    a2_ref[...] = a1.astype(a2_ref.dtype)                         # bf16 scratch

    # ---- conv2: one dot, all 9 taps folded into the contraction (K = 9*c1) ----
    o2 = jnp.dot(a2_ref[...], w2_ref[...],
                 preferred_element_type=jnp.float32)              # (m, c2p) f32
    o2 = jnp.maximum(o2 + b2_ref[...], 0.0)

    # ---- global average pool (scale folded into wc) + classifier ----
    pooled = jnp.sum(o2.reshape(blk_b, hw, o2.shape[-1]), axis=1)  # (blk_b, c2p)
    out = jnp.dot(pooled.astype(wc_ref.dtype), wc_ref[...],
                  preferred_element_type=jnp.float32) + bc_ref[...]
    o_ref[...] = out.reshape(o_ref.shape)


# ------------------------------ JAX wrapper ---------------------------------

@functools.partial(jax.jit, static_argnames=("block_b",))
def smaller_forward(x_nchw, params, block_b=4):
    n, cin, h, w = x_nchw.shape
    assert h % 2 == 0 and w % 2 == 0
    c1 = params["w1"].shape[-1]
    c2 = params["w2"].shape[-1]
    nout = params["wc"].shape[-1]
    assert c1 % 8 == 0
    h2, w2 = h // 2, w // 2
    hw = h2 * w2
    inv_area = 1.0 / float(hw)              # average-pool scale (folded into wc)

    kc = 9 * c1                              # conv2 contraction: (di, dj, c1)
    k1 = 25 * cin                            # conv1 contraction: 5x5 input patch
    k1p = _round_up(k1, 8)
    c2p = _round_up(c2, 8)
    nop = _round_up(nout, LANES)
    blk_b = max(1, min(block_b, n))
    n_pad = _round_up(n, blk_b)
    n_blocks = n_pad // blk_b

    # -- layout glue (XLA, cheap): batch pad, NCHW->NHWC, conv2-level im2col --
    x = jnp.transpose(x_nchw, (0, 2, 3, 1)).astype(jnp.float32)
    if n_pad != n:
        x = jnp.pad(x, ((0, n_pad - n), (0, 0), (0, 0), (0, 0)))
    xp2 = jnp.pad(x, ((0, 0), (2, 2), (2, 2), (0, 0)))   # conv1 pad + conv2 pad
    slabs = []
    for a in range(5):
        for b in range(5):
            slabs.append(xp2[:, a:a + 2 * h2 - 1:2, b:b + 2 * w2 - 1:2, :])
    p = jnp.stack(slabs, axis=3)                          # (n_pad, h2, w2, 25, cin)
    p = p.reshape(n_pad * hw, k1)
    p = jnp.pad(p, ((0, 0), (0, k1p - k1))).astype(jnp.bfloat16)

    # -- conv1 weights replicated into conv2's folded-tap layout --
    # w1r[(a,b,ci), (di,dj,c)] = w1[a-di, b-dj, ci, c] when in range, else 0
    w1 = params["w1"].astype(jnp.float32)                 # (3,3,cin,c1) HWIO
    w1r = jnp.zeros((5, 5, cin, 3, 3, c1), jnp.float32)
    for di in range(3):
        for dj in range(3):
            w1r = w1r.at[di:di + 3, dj:dj + 3, :, di, dj, :].set(w1)
    w1r = jnp.pad(w1r.reshape(k1, kc),
                  ((0, k1p - k1), (0, 0))).astype(jnp.bfloat16)
    b1r = jnp.tile(params["b1"].astype(jnp.float32), 9).reshape(1, kc)

    # -- border mask: zero conv2-input entries that fall on the zero padding --
    uu = (jnp.arange(hw, dtype=jnp.int32) // w2)[:, None]
    vv = (jnp.arange(hw, dtype=jnp.int32) % w2)[:, None]
    ll = jnp.arange(kc, dtype=jnp.int32)[None, :]
    di_l = ll // (3 * c1)
    dj_l = (ll // c1) % 3
    pad_pos = ((uu == 0) & (di_l == 0)) | ((vv == 0) & (dj_l == 0))
    mask = jnp.where(pad_pos, 0.0, 1.0).astype(jnp.float32)         # (hw, kc)

    # -- conv2 / classifier weights (pool scale folded into wcs) --
    w2r = jnp.pad(params["w2"].astype(jnp.float32).reshape(kc, c2),
                  ((0, 0), (0, c2p - c2))).astype(jnp.bfloat16)
    b2r = jnp.pad(params["b2"].astype(jnp.float32),
                  (0, c2p - c2)).reshape(1, c2p)
    wcs = jnp.pad(params["wc"].astype(jnp.float32) * inv_area,
                  ((0, c2p - c2), (0, nop - nout))).astype(jnp.bfloat16)
    bcp = jnp.pad(params["bc"].astype(jnp.float32),
                  (0, nop - nout)).reshape(1, nop)

    out = pl.pallas_call(
        _fused_kernel,
        out_shape=jax.ShapeDtypeStruct((n_blocks, blk_b, nop), jnp.float32),
        grid_spec=pltpu.PrefetchScalarGridSpec(
            num_scalar_prefetch=0,
            grid=(n_blocks,),
            in_specs=[
                pl.BlockSpec((blk_b * hw, k1p), lambda i: (i, 0)),
                pl.BlockSpec((k1p, kc), lambda i: (0, 0)),
                pl.BlockSpec((1, kc), lambda i: (0, 0)),
                pl.BlockSpec((hw, kc), lambda i: (0, 0)),
                pl.BlockSpec((kc, c2p), lambda i: (0, 0)),
                pl.BlockSpec((1, c2p), lambda i: (0, 0)),
                pl.BlockSpec((c2p, nop), lambda i: (0, 0)),
                pl.BlockSpec((1, nop), lambda i: (0, 0)),
            ],
            out_specs=pl.BlockSpec((1, blk_b, nop), lambda i: (i, 0, 0)),
            scratch_shapes=[pltpu.VMEM((blk_b * hw, kc), jnp.bfloat16)],
        ),
        compiler_params=pltpu.CompilerParams(
            dimension_semantics=("parallel",),
        ),
    )(p, w1r, b1r, mask, w2r, b2r, wcs, bcp)

    return out.reshape(n_pad, nop)[:n, :nout]


# ------------------------------ Reference ----------------------------------

def smaller_forward_ref(x_nchw, params):
    dn = ("NHWC", "HWIO", "NHWC")
    x = jnp.transpose(x_nchw, (0, 2, 3, 1))
    # explicit symmetric padding, matching PyTorch Conv2d(padding=1) semantics
    x = jax.lax.conv_general_dilated(x, params["w1"], (1, 1), ((1, 1), (1, 1)),
                                     dimension_numbers=dn) + params["b1"]
    x = jnp.maximum(x, 0.0)
    x = jax.lax.conv_general_dilated(x, params["w2"], (2, 2), ((1, 1), (1, 1)),
                                     dimension_numbers=dn) + params["b2"]
    x = jnp.maximum(x, 0.0)
    pooled = jnp.mean(x, axis=(1, 2))                               # (N, C2)
    return pooled @ params["wc"] + params["bc"]


# -------------------------------- Main --------------------------------------

if __name__ == "__main__":
    key = jax.random.PRNGKey(0)
    k_x, k_w1, k_b1, k_w2, k_b2, k_wc, k_bc = jax.random.split(key, 7)

    N, CIN, H, W = 8, 3, 16, 16      # CIFAR-like small input (NCHW)
    C1, C2 = 16, 32                  # truncated-features channel widths

    x = jax.random.normal(k_x, (N, CIN, H, W), dtype=jnp.float32)

    params = {
        # conv weights in HWIO layout (kh, kw, Cin, Cout)
        "w1": jax.random.normal(k_w1, (3, 3, CIN, C1), jnp.float32) * 0.1,
        "b1": jax.random.normal(k_b1, (C1,), jnp.float32) * 0.1,
        "w2": jax.random.normal(k_w2, (3, 3, C1, C2), jnp.float32) * 0.1,
        "b2": jax.random.normal(k_b2, (C2,), jnp.float32) * 0.1,
        # Linear(num_output_channels=C2, 10): stored as [C2, 10] (x @ W)
        "wc": jax.random.normal(k_wc, (C2, 10), jnp.float32) * 0.1,
        "bc": jax.random.normal(k_bc, (10,), jnp.float32) * 0.1,
    }

    out = jax.block_until_ready(smaller_forward(x, params))
    ref = jax.block_until_ready(smaller_forward_ref(x, params))

    assert out.shape == (N, 10) and out.dtype == jnp.float32
    # bf16 MXU operands with f32 accumulation: tolerance relaxed vs the f32 path.
    np.testing.assert_allclose(np.asarray(out), np.asarray(ref),
                               rtol=2e-2, atol=2e-2)
    print("KERNEL_OK")
</pallas_src>

<mosaic_0001>
module attributes {stable_mosaic.version = 11 : i64} {
  func.func @_fused_kernel(%arg0: i32, %arg1: memref<256x80xbf16, #tpu.memory_space<vmem>>, %arg2: memref<80x144xbf16, #tpu.memory_space<vmem>>, %arg3: memref<1x144xf32, #tpu.memory_space<vmem>>, %arg4: memref<64x144xf32, #tpu.memory_space<vmem>>, %arg5: memref<144x32xbf16, #tpu.memory_space<vmem>>, %arg6: memref<1x32xf32, #tpu.memory_space<vmem>>, %arg7: memref<32x128xbf16, #tpu.memory_space<vmem>>, %arg8: memref<1x128xf32, #tpu.memory_space<vmem>>, %arg9: memref<1x4x128xf32, #tpu.memory_space<vmem>>, %arg10: memref<256x144xbf16, #tpu.memory_space<vmem>>) attributes {dimension_semantics = [#tpu.dimension_semantics<parallel>], iteration_bounds = array<i64: 2>, scalar_prefetch = 0 : i64, scratch_operands = 1 : i64, tpu.core_type = #tpu.core_type<tc>, window_params = [{transform_indices = @transform_0, window_bounds = array<i64: 256, 80>}, {pipeline_mode = #tpu.pipeline_mode<synchronous>, transform_indices = @transform_1, window_bounds = array<i64: 80, 144>}, {pipeline_mode = #tpu.pipeline_mode<synchronous>, transform_indices = @transform_2, window_bounds = array<i64: 1, 144>}, {pipeline_mode = #tpu.pipeline_mode<synchronous>, transform_indices = @transform_3, window_bounds = array<i64: 64, 144>}, {pipeline_mode = #tpu.pipeline_mode<synchronous>, transform_indices = @transform_4, window_bounds = array<i64: 144, 32>}, {pipeline_mode = #tpu.pipeline_mode<synchronous>, transform_indices = @transform_5, window_bounds = array<i64: 1, 32>}, {pipeline_mode = #tpu.pipeline_mode<synchronous>, transform_indices = @transform_6, window_bounds = array<i64: 32, 128>}, {pipeline_mode = #tpu.pipeline_mode<synchronous>, transform_indices = @transform_7, window_bounds = array<i64: 1, 128>}, {transform_indices = @transform_8, window_bounds = array<i64: 1, 4, 128>}]} {
    %c0 = arith.constant 0 : index
    %c0_0 = arith.constant 0 : index
    %0 = vector.load %arg1[%c0, %c0_0] : memref<256x80xbf16, #tpu.memory_space<vmem>>, vector<256x80xbf16>
    %c0_1 = arith.constant 0 : index
    %c0_2 = arith.constant 0 : index
    %1 = vector.load %arg2[%c0_1, %c0_2] : memref<80x144xbf16, #tpu.memory_space<vmem>>, vector<80x144xbf16>
    %cst = arith.constant dense<0.000000e+00> : vector<256x144xf32>
    %2 = tpu.matmul %0, %1, %cst {dimension_numbers = #tpu.dot_dimension_numbers<[1], [0], [0], [1], [0, 0, 1, 1], [], []>} : vector<256x80xbf16>, vector<80x144xbf16>, vector<256x144xf32> -> vector<256x144xf32>
    %c0_3 = arith.constant 0 : index
    %c0_4 = arith.constant 0 : index
    %3 = vector.load %arg3[%c0_3, %c0_4] : memref<1x144xf32, #tpu.memory_space<vmem>>, vector<1x144xf32>
    %4 = vector.broadcast %3 : vector<1x144xf32> to vector<256x144xf32>
    %5 = arith.addf %2, %4 : vector<256x144xf32>
    %cst_5 = arith.constant 0.000000e+00 : f32
    %6 = vector.broadcast %cst_5 : f32 to vector<256x144xf32>
    %7 = arith.maximumf %5, %6 : vector<256x144xf32>
    %8 = vector.shape_cast %7 : vector<256x144xf32> to vector<4x64x144xf32>
    %c0_6 = arith.constant 0 : index
    %c0_7 = arith.constant 0 : index
    %9 = vector.load %arg4[%c0_6, %c0_7] : memref<64x144xf32, #tpu.memory_space<vmem>>, vector<64x144xf32>
    %10 = vector.shape_cast %9 : vector<64x144xf32> to vector<1x64x144xf32>
    %11 = vector.broadcast %10 : vector<1x64x144xf32> to vector<4x64x144xf32>
    %12 = arith.mulf %8, %11 : vector<4x64x144xf32>
    %13 = vector.shape_cast %12 : vector<4x64x144xf32> to vector<256x144xf32>
    %14 = arith.truncf %13 : vector<256x144xf32> to vector<256x144xbf16>
    %c0_8 = arith.constant 0 : index
    %c0_9 = arith.constant 0 : index
    %15 = vector.load %arg10[%c0_8, %c0_9] : memref<256x144xbf16, #tpu.memory_space<vmem>>, vector<256x144xbf16>
    tpu.vector_store %arg10[%c0_8, %c0_9], %14 {strides = array<i32>} : memref<256x144xbf16, #tpu.memory_space<vmem>>, vector<256x144xbf16>,
    %c0_10 = arith.constant 0 : index
    %c0_11 = arith.constant 0 : index
    %16 = vector.load %arg10[%c0_10, %c0_11] : memref<256x144xbf16, #tpu.memory_space<vmem>>, vector<256x144xbf16>
    %c0_12 = arith.constant 0 : index
    %c0_13 = arith.constant 0 : index
    %17 = vector.load %arg5[%c0_12, %c0_13] : memref<144x32xbf16, #tpu.memory_space<vmem>>, vector<144x32xbf16>
    %cst_14 = arith.constant dense<0.000000e+00> : vector<256x32xf32>
    %18 = tpu.matmul %16, %17, %cst_14 {dimension_numbers = #tpu.dot_dimension_numbers<[1], [0], [0], [1], [0, 0, 1, 1], [], []>} : vector<256x144xbf16>, vector<144x32xbf16>, vector<256x32xf32> -> vector<256x32xf32>
    %c0_15 = arith.constant 0 : index
    %c0_16 = arith.constant 0 : index
    %19 = vector.load %arg6[%c0_15, %c0_16] : memref<1x32xf32, #tpu.memory_space<vmem>>, vector<1x32xf32>
    %20 = vector.broadcast %19 : vector<1x32xf32> to vector<256x32xf32>
    %21 = arith.addf %18, %20 : vector<256x32xf32>
    %cst_17 = arith.constant 0.000000e+00 : f32
    %22 = vector.broadcast %cst_17 : f32 to vector<256x32xf32>
    %23 = arith.maximumf %21, %22 : vector<256x32xf32>
    %24 = vector.shape_cast %23 : vector<256x32xf32> to vector<4x64x32xf32>
    %cst_18 = arith.constant dense<0.000000e+00> : vector<4x32xf32>
    %25 = vector.multi_reduction <add>, %24, %cst_18 [1] : vector<4x64x32xf32> to vector<4x32xf32>
    %26 = arith.truncf %25 : vector<4x32xf32> to vector<4x32xbf16>
    %c0_19 = arith.constant 0 : index
    %c0_20 = arith.constant 0 : index
    %27 = vector.load %arg7[%c0_19, %c0_20] : memref<32x128xbf16, #tpu.memory_space<vmem>>, vector<32x128xbf16>
    %cst_21 = arith.constant dense<0.000000e+00> : vector<4x128xf32>
    %28 = tpu.matmul %26, %27, %cst_21 {dimension_numbers = #tpu.dot_dimension_numbers<[1], [0], [0], [1], [0, 0, 1, 1], [], []>} : vector<4x32xbf16>, vector<32x128xbf16>, vector<4x128xf32> -> vector<4x128xf32>
    %c0_22 = arith.constant 0 : index
    %c0_23 = arith.constant 0 : index
    %29 = vector.load %arg8[%c0_22, %c0_23] : memref<1x128xf32, #tpu.memory_space<vmem>>, vector<1x128xf32>
    %30 = vector.broadcast %29 : vector<1x128xf32> to vector<4x128xf32>
    %31 = arith.addf %28, %30 : vector<4x128xf32>
    %32 = vector.shape_cast %31 : vector<4x128xf32> to vector<1x4x128xf32>
    %c0_24 = arith.constant 0 : index
    %c0_25 = arith.constant 0 : index
    %c0_26 = arith.constant 0 : index
    %33 = vector.load %arg9[%c0_24, %c0_25, %c0_26] : memref<1x4x128xf32, #tpu.memory_space<vmem>>, vector<1x4x128xf32>
    tpu.vector_store %arg9[%c0_24, %c0_25, %c0_26], %32 {strides = array<i32>} : memref<1x4x128xf32, #tpu.memory_space<vmem>>, vector<1x4x128xf32>,
    return
  }
  func.func @transform_0(%arg0: i32) -> (i32, i32) {
    %c0_i32 = arith.constant 0 : i32
    %c0_i32_0 = arith.constant 0 : i32
    return %arg0, %c0_i32 : i32, i32
  }
  func.func @transform_1(%arg0: i32) -> (i32, i32) {
    %c0_i32 = arith.constant 0 : i32
    %c0_i32_0 = arith.constant 0 : i32
    %c0_i32_1 = arith.constant 0 : i32
    return %c0_i32, %c0_i32_0 : i32, i32
  }
  func.func @transform_2(%arg0: i32) -> (i32, i32) {
    %c0_i32 = arith.constant 0 : i32
    %c0_i32_0 = arith.constant 0 : i32
    %c0_i32_1 = arith.constant 0 : i32
    return %c0_i32, %c0_i32_0 : i32, i32
  }
  func.func @transform_3(%arg0: i32) -> (i32, i32) {
    %c0_i32 = arith.constant 0 : i32
    %c0_i32_0 = arith.constant 0 : i32
    %c0_i32_1 = arith.constant 0 : i32
    return %c0_i32, %c0_i32_0 : i32, i32
  }
  func.func @transform_4(%arg0: i32) -> (i32, i32) {
    %c0_i32 = arith.constant 0 : i32
    %c0_i32_0 = arith.constant 0 : i32
    %c0_i32_1 = arith.constant 0 : i32
    return %c0_i32, %c0_i32_0 : i32, i32
  }
  func.func @transform_5(%arg0: i32) -> (i32, i32) {
    %c0_i32 = arith.constant 0 : i32
    %c0_i32_0 = arith.constant 0 : i32
    %c0_i32_1 = arith.constant 0 : i32
    return %c0_i32, %c0_i32_0 : i32, i32
  }
  func.func @transform_6(%arg0: i32) -> (i32, i32) {
    %c0_i32 = arith.constant 0 : i32
    %c0_i32_0 = arith.constant 0 : i32
    %c0_i32_1 = arith.constant 0 : i32
    return %c0_i32, %c0_i32_0 : i32, i32
  }
  func.func @transform_7(%arg0: i32) -> (i32, i32) {
    %c0_i32 = arith.constant 0 : i32
    %c0_i32_0 = arith.constant 0 : i32
    %c0_i32_1 = arith.constant 0 : i32
    return %c0_i32, %c0_i32_0 : i32, i32
  }
  func.func @transform_8(%arg0: i32) -> (i32, i32, i32) {
    %c0_i32 = arith.constant 0 : i32
    %c0_i32_0 = arith.constant 0 : i32
    %c0_i32_1 = arith.constant 0 : i32
    return %arg0, %c0_i32, %c0_i32_0 : i32, i32, i32
  }
}

</mosaic_0001>

<bundles_post_ra>
// kernel: tile.8
= control target key start
LH: loop header
LB: loop body
LE: loop exit
PB: predicated region body
PF: predicated region fallthrough
CT: control target
= control target key end

     0   :  { %s28_s0 = inlined_call_operand.vmem [shape: f32[16], index: 0, kind: input, shape index: {}]   ;;  %s29_s1 = inlined_call_operand.vmem [shape: f32[9,16], index: 1, kind: output, shape index: {}]  }
   0x1   :  { %v4_v0 = vld [vmem:[%s28_s0] ss:$0 sm:$0xff] }
   0x2   :  { %5 = vst [vmem:[%s29_s1] sm:$0xff] %v4_v0  ;;  %8 = vst [vmem:[%s29_s1 + $0x8] sm:$0xff] %v4_v0 }

// kernel: tile.9
= control target key start
LH: loop header
LB: loop body
LE: loop exit
PB: predicated region body
PF: predicated region fallthrough
CT: control target
= control target key end

     0   :  { %s74_s10 = smov 112   ;;  %s75_s11 = smov 80   ;;  %vm4_vm0 = vcmask 130048   ;;  %vm10_vm1 = vcmask 1048448   ;;  %vm16_vm2 = vcmask 917248   ;;  %vm22_vm3 = vcmask 786048   ;;  %s121_s0 = inlined_call_operand.vmem [shape: f32[9,16], index: 0, kind: input, shape index: {}]   ;;  %s122_s1 = inlined_call_operand.vmem [shape: f32[1,144], index: 1, kind: output, shape index: {}]  }
   0x1   :  { %v59_v0 = vld [vmem:[%s121_s0 + $0x7] sm:$0x1]   ;;  %v61_v1 = vld [vmem:[%s121_s0 + $0x5] sm:$0x1]   ;;  %v60_v2 = vld [vmem:[%s121_s0 + $0x6] sm:$0x1]  }
   0x2   :  { %8 = vrot.lane.b32.xlu0 %v59_v0, %s74_s10  ;;  %20 = vrot.lane.b32.xlu1 %v61_v1, %s75_s11  ;;  %v62_v3 = vld [vmem:[%s121_s0 + $0x4] sm:$0x1]   ;;  %s2_s16 = smov 3  ;;  %s76_s19 = smov 96   ;;  %v63_v5 = vld [vmem:[%s121_s0 + $0x3] sm:$0x1]  }
   0x3   :  { %v3_v4 = vld [vmem:[%s121_s0] ss:$8 sm:%s2_s16]   ;;  %s77_s20 = smov 64   ;;  %v64_v6 = vld [vmem:[%s121_s0 + $0x2] sm:$0x1]   ;;  %s78_s25 = smov 48  }
   0x4   :  { %5 = vst.msk [vmem:[#allocation0] ss:$8 sm:$0x3] %vm4_vm0, %v3_v4   ;;  %s79_s26 = smov 32   ;;  %v65_v7 = vld [vmem:[%s121_s0 + $0x1] sm:$0x1]  }
   0x5   :  { %s80_s0 = smov 16   ;;  %vm28_vm4 = vcmask 654848   ;;  %vm34_vm5 = vcmask 523648   ;;  %vm40_vm6 = vcmask 392448   ;;  %vm46_vm7 = vcmask 261248  }
   0x6   :  { %14 = vrot.lane.b32.xlu0 %v60_v2, %s76_s19  ;;  %26 = vrot.lane.b32.xlu1 %v62_v3, %s77_s20 }
   0xa   :  { %32 = vrot.lane.b32.xlu0 %v63_v5, %s78_s25  ;;  %38 = vrot.lane.b32.xlu1 %v64_v6, %s79_s26 }
   0xb   :  { %v55_v8 = vld [vmem:[#allocation0 + $0x8] sm:$0x1] }
   0xc   :  { %66 = vst [vmem:[%s122_s1 + $0x1] sm:$0x1] %v55_v8 }
   0xe   :  { %44 = vrot.lane.b32.xlu0 %v65_v7, %s80_s0 }
  0x74   :  { %v9_v9 = vpop.permute.xlu0 %8   ;;  %v21_v10 = vpop.permute.xlu1 %20  }
  0x75   :  { %11 = vst.msk [vmem:[#allocation0] sm:$0x1] %vm10_vm1, %v9_v9  }
  0x78   :  { %v15_v11 = vpop.permute.xlu0 %14   ;;  %v27_v12 = vpop.permute.xlu1 %26  }
  0x79   :  { %17 = vst.msk [vmem:[#allocation0] sm:$0x1] %vm16_vm2, %v15_v11  }
  0x7a   :  { %23 = vst.msk [vmem:[#allocation0] sm:$0x1] %vm22_vm3, %v21_v10  }
  0x7b   :  { %29 = vst.msk [vmem:[#allocation0] sm:$0x1] %vm28_vm4, %v27_v12  }
  0x7c   :  { %v33_v13 = vpop.permute.xlu0 %32   ;;  %v39_v14 = vpop.permute.xlu1 %38  }
  0x7d   :  { %35 = vst.msk [vmem:[#allocation0] sm:$0x1] %vm34_vm5, %v33_v13  }
  0x7e   :  { %41 = vst.msk [vmem:[#allocation0] sm:$0x1] %vm40_vm6, %v39_v14  }
  0x80   :  { %v45_v15 = vpop.permute.xlu0 %44  }
  0x81   :  { %47 = vst.msk [vmem:[#allocation0] sm:$0x1] %vm46_vm7, %v45_v15  }
  0x88   :  { %v51_v16 = vld [vmem:[#allocation0] sm:$0x1] }
  0x89   :  { %53 = vst [vmem:[%s122_s1] sm:$0x1] %v51_v16 }

// kernel: smaller_forward.1
= control target key start
LH: loop header
LB: loop body
LE: loop exit
PB: predicated region body
PF: predicated region fallthrough
CT: control target
= control target key end

     0   :  { %13 = vsyncpa [#allocation4], 0  ;;  %s2370_s0 = inlined_call_operand.vmem [shape: bf16[512,80], index: 0, kind: input, shape index: {}]   ;;  %s2371_s1 = inlined_call_operand.vmem [shape: bf16[80,144], index: 1, kind: input, shape index: {}]   ;;  %s2372_s2 = inlined_call_operand.vmem [shape: f32[1,144], index: 2, kind: input, shape index: {}]   ;;  %s2373_s3 = inlined_call_operand.vmem [shape: f32[64,144], index: 3, kind: input, shape index: {}]   ;;  %s2374_s4 = inlined_call_operand.vmem [shape: bf16[144,32], index: 4, kind: input, shape index: {}]   ;;  %s2375_s5 = inlined_call_operand.vmem [shape: f32[1,32], index: 5, kind: input, shape index: {}]   ;;  %s2376_s6 = inlined_call_operand.vmem [shape: bf16[32,128], index: 6, kind: input, shape index: {}]   ;;  %s2377_s7 = inlined_call_operand.vmem [shape: f32[1,128], index: 7, kind: input, shape index: {}]   ;;  %s2378_s8 = inlined_call_operand.hbm [shape: f32[2,4,128], index: 8, kind: output, shape index: {}]  }
   0x1   :  { %15 = vsyncpa [#allocation4 + $0x1], 0  ;;  %s1829_s27 = smov 0   ;;  %s1831_s28 = smov 0  }
   0x2   :  { %s1833_s29 = smov 0   ;;  %s1835_s30 = smov 0  }
   0x3 LB: > { %s1850_s9 = sadd.s32 4294967295, %s1778_s30   ;;  %s1538_s10 = sadd.s32 4294967294, %s1778_s30   ;;  %s1778_s30 = sphi %s1835_s30, %s2384_s30   ;;  %s1774_s29 = sphi %s1833_s29, %s2383_s29   ;;  %s1770_s28 = sphi %s1831_s28, %s2382_s28   ;;  %s1766_s27 = sphi %s1829_s27, %s2381_s27  }
   0x4   : > { %s1854_s11 = sadd.s32 1, %s1778_s30   ;;  %s201_s12 = sadd.s32 1, %s1774_s29 }
   0x5   : > { %s198_s13 = ssub.s32 %s1778_s30, %s1854_s11  ;;  %p211_p0 = scmp.ne.s32.totalorder %s1774_s29, %s1770_s28 }
   0x6   : > { %p199_p1 = scmp.eq.s32.totalorder %s198_s13, 0  ;;  %p212_p2 = scmp.eq.s32.totalorder %s1850_s9, 1 }
   0x7   : > { %p217_p3 = scmp.ne.s32.totalorder %s1770_s28, %s1766_s27  ;;  %p218_p4 = scmp.eq.s32.totalorder %s1538_s10, 1 }
   0x8   : > { %s1865_s14 = scalar_select %p199_p1, %s1774_s29, %s201_s12  }
   0x9   : > { %p1867_p5 = por %p212_p2, %p211_p0  ;;  %p1871_p6 = por %p218_p4, %p217_p3 }
   0xa   : > { %p1541_p7 = scmp.ge.s32.totalorder %s1778_s30, 1  ;;  %p266_p8 = scmp.lt.s32.totalorder %s1778_s30, 3 }
   0xc   : > { %p267_p9 = pnand %p1541_p7, %p266_p8 }
   0xd   : > { %v1674_v0 = vld [vmem:[%s2371_s1 + $0x4] ss:$8 sps:$4 sm:$0xff] (!%p267_p9)   ;;  %s1543_s19 = sshll.u32 (!%p267_p9), %s1850_s9, 5  ;;  %v1676_v1 = vld [vmem:[%s2371_s1] ss:$8 sps:$4 sm:$0xff] (!%p267_p9)   ;;  %v1780_v2 = vmov (!%p267_p9), 0   ;;  %v351_v36 = vlaneseq (!%p267_p9) }
   0xe   : > { %270 = sbr.rel (%p267_p9) target bundleno = 855 (0x357), region = 52  ;;  %572 = vmatprep.mubr.bf16.mxu0 (!%p267_p9), %v1780_v2  ;;  %p301_p10 = scmp.lt.s32.totalorder (!%p267_p9), %s1543_s19, 63  ;;  %1101 = vmatprep.subr.bf16.mxu1 (!%p267_p9), %v1780_v2  ;;  %v1677_v3 = vld [vmem:[%s2371_s1 + $0x14] ss:$8 sps:$4 sm:$0xff] (!%p267_p9)   ;;  %v1679_v4 = vld [vmem:[%s2371_s1 + $0x10] ss:$8 sps:$4 sm:$0xff] (!%p267_p9)  }
   0xf   : > { %540 = vmatprep.subr.bf16.mxu0 (!%p267_p9), %v1674_v0  ;;  %v1680_v5 = vld [vmem:[%s2371_s1 + $0x24] ss:$8 sps:$4 sm:$0xff] (!%p267_p9)   ;;  %v1682_v6 = vld [vmem:[%s2371_s1 + $0x20] ss:$8 sps:$4 sm:$0xff] (!%p267_p9)   ;;  %v1683_v7 = vld [vmem:[%s2371_s1 + $0x34] ss:$8 sps:$4 sm:$0xff] (!%p267_p9)  }
  0x10   : > { %541 = vmatpush1.bf16.msra.mxu0 (!%p267_p9), %v1676_v1  ;;  %v1685_v8 = vld [vmem:[%s2371_s1 + $0x30] ss:$8 sps:$4 sm:$0xff] (!%p267_p9)   ;;  %v1686_v9 = vld [vmem:[%s2371_s1 + $0x44] ss:$8 sps:$4 sm:$0xff] (!%p267_p9)   ;;  %v1688_v10 = vld [vmem:[%s2371_s1 + $0x40] ss:$8 sps:$4 sm:$0xff] (!%p267_p9)  }
  0x11   : > { %542 = vmatprep.subr.bf16.mxu0 (!%p267_p9), %v1677_v3  ;;  %vm491_vm0 = vcmask (!%p267_p9), 654336   ;;  %v1705_v12 = vld [vmem:[%s2374_s4] sm:$0xff] (!%p267_p9)   ;;  %v1706_v13 = vld [vmem:[%s2374_s4 + $0x8] sm:$0xff] (!%p267_p9)   ;;  %v1707_v15 = vld [vmem:[%s2374_s4 + $0x10] sm:$0xff] (!%p267_p9)   ;;  %v352_v37 = vshrl.u32 (!%p267_p9), %v351_v36, 7  ;;  %vm910_vm1 = vcmask (!%p267_p9), 130048  }
  0x12   : > { %1102 = vmatpush1.bf16.msra.mxu1 (!%p267_p9), %v1705_v12  ;;  %v1708_v16 = vld [vmem:[%s2374_s4 + $0x18] sm:$0xff] (!%p267_p9)   ;;  %v1709_v26 = vld [vmem:[%s2374_s4 + $0x20] sm:$0xff] (!%p267_p9)   ;;  %v1710_v28 = vld [vmem:[%s2374_s4 + $0x28] sm:$0xff] (!%p267_p9)   ;;  %vm1294_vm2 = vcmask (!%p267_p9), 261120   ;;  %vm1782_vm3 = vmmov (!%p267_p9), 0   ;;  %vm1402_vm4 = vcmask (!%p267_p9), 1041409  }
  0x13   : > { %1103 = vmatprep.subr.bf16.mxu1 (!%p267_p9), %v1780_v2  ;;  %v1711_v29 = vld [vmem:[%s2374_s4 + $0x30] sm:$0xff] (!%p267_p9)   ;;  %v1712_v31 = vld [vmem:[%s2374_s4 + $0x38] sm:$0xff] (!%p267_p9)   ;;  %v1713_v32 = vld [vmem:[%s2374_s4 + $0x40] sm:$0xff] (!%p267_p9)   ;;  %v353_v38 = vsub.s32 (!%p267_p9), 0, %v352_v37  ;;  %v357_v40 = vsub.s32 (!%p267_p9), 1, %v352_v37  ;;  %vm1404_vm5 = vcmask (!%p267_p9), 1042434  }
  0x14   : > { %543 = vmatpush1.bf16.msra.mxu0 (!%p267_p9), %v1679_v4  ;;  %v349_v39 = vld [vmem:[%s2372_s2] sm:$0x3] (!%p267_p9)  ;;  %v2015_v53 = vld [vmem:[%s2373_s3 + $0x10] sm:$0xff] (!%p267_p9)  ;;  %v2021_v55 = vld [vmem:[%s2373_s3 + $0x8] sm:$0xff] (!%p267_p9)  ;;  %vm1406_vm6 = vcmask (!%p267_p9), 1043459   ;;  %s1618_s10 = sshll.u32 (!%p267_p9), %s1850_s9, 6 }
  0x15   : > { %s2386_s19 = smov (!%p301_p10, %s1543_s19), 63  ;;  %544 = vmatprep.subr.bf16.mxu0 %v1680_v5  ;;  %v2000_v41 = vrot.slane %v349_v39, %v353_v38  ;;  %v2002_v42 = vrot.slane %v349_v39, %v357_v40  ;;  %v2010_v51 = vld [vmem:[%s2373_s3] sm:$0xff]  ;;  %v2026_v57 = vld [vmem:[%s2373_s3 + $0x18] sm:$0xff]  ;;  %v2080_v36 = vld [vmem:[%s2373_s3 + $0x48] sm:$0xff]  ;;  %s2328_s21 = scalar_lea.hbm %s2378_s8, %s1618_s10 }
  0x16   : > { %s1544_s12 = sshll.u32 %s2386_s19, 2  ;;  %1104 = vmatpush1.bf16.msra.mxu1 %v1706_v13  ;;  %v2050_v13 = vld [vmem:[%s2373_s3 + $0x28] sm:$0xff]  ;;  %v2085_v38 = vld [vmem:[%s2373_s3 + $0x58] sm:$0xff]  ;;  %s297_s19 = sand.u32 1, %s1770_s28  }
  0x17   : > { %s1898_s18 = scalar_lea.vmem %s2370_s0, %s1544_s12  ;;  %1105 = vmatprep.subr.bf16.mxu1 %v1780_v2  ;;  %s1466_s22 = scalar_lea.sflag [#allocation4], %s297_s19 }
  0x18   : > { %545 = vmatpush1.bf16.msra.mxu0 %v1682_v6  ;;  %v1689_v11 = vld [vmem:[%s1898_s18] sm:$0xff]   ;;  %v1690_v14 = vld [vmem:[%s1898_s18 + $0x8] sm:$0xff]   ;;  %v1691_v17 = vld [vmem:[%s1898_s18 + $0x10] sm:$0xff]   ;;  %s1783_s23 = smov [#allocation3]  }
  0x19   : > { %546 = vmatprep.subr.bf16.mxu0 %v1683_v7  ;;  %v1692_v18 = vld [vmem:[%s1898_s18 + $0x18] sm:$0xff]   ;;  %v1693_v19 = vld [vmem:[%s1898_s18 + $0x20] sm:$0xff]   ;;  %v1694_v20 = vld [vmem:[%s1898_s18 + $0x28] sm:$0xff]   ;;  %s1720_s24 = sshll.u32 %s1783_s23, 4  ;;  %s1721_s24 = int_to_ptr.vmem [resolvable:$false] %s1720_s24 }
  0x1a   : > { %1106 = vmatpush1.bf16.msra.mxu1 %v1707_v15  ;;  %v1695_v21 = vld [vmem:[%s1898_s18 + $0x30] sm:$0xff]   ;;  %v1696_v22 = vld [vmem:[%s1898_s18 + $0x38] sm:$0xff]   ;;  %v1697_v23 = vld [vmem:[%s1898_s18 + $0x40] sm:$0xff]  }
  0x1b   : > { %1107 = vmatprep.subr.bf16.mxu1 %v1780_v2  ;;  %v1698_v24 = vld [vmem:[%s1898_s18 + $0x48] sm:$0xff]   ;;  %v1699_v25 = vld [vmem:[%s1898_s18 + $0x50] sm:$0xff]   ;;  %v1700_v27 = vld [vmem:[%s1898_s18 + $0x58] sm:$0xff]  }
  0x1c   : > { %547 = vmatpush1.bf16.msra.mxu0 %v1685_v8  ;;  %v1701_v30 = vld [vmem:[%s1898_s18 + $0x60] sm:$0xff]   ;;  %v1702_v33 = vld [vmem:[%s1898_s18 + $0x68] sm:$0xff]   ;;  %v1703_v34 = vld [vmem:[%s1898_s18 + $0x70] sm:$0xff]  }
  0x1d   : > { %548 = vmatprep.subr.bf16.mxu0 %v1686_v9  ;;  %v1704_v35 = vld [vmem:[%s1898_s18 + $0x78] sm:$0xff]   ;;  %v2039_v9 = vld [vmem:[%s2373_s3 + $0x20] sm:$0xff]  ;;  %s1542_s18 = sshll.u32 %s297_s19, 2 }
  0x1e   : > { %1108 = vmatpush1.bf16.msra.mxu1 %v1708_v16  ;;  %v2055_v15 = vld [vmem:[%s2373_s3 + $0x38] sm:$0xff]  ;;  %s299_s12 = scalar_lea.vmem [#allocation3], %s1542_s18  ;;  %s1722_s18 = scalar_lea.vmem %s1721_s24, 128 }
  0x1f   : > { %1109 = vmatprep.subr.bf16.mxu1 %v1780_v2  ;;  %s1479_s13 = sshll.u32 %s299_s12, 4  ;;  %s2330_s13 = int_to_ptr.vmem [resolvable:$true] %s1479_s13 }
  0x20   : > { %549 = vmatpush1.bf16.msra.mxu0 %v1688_v10  ;;  %s1716_s9 = scalar_lea.vmem %s2330_s13, 64  ;;  %p1723_p0 = scmp.lt.s32.totalorder %s2330_s13, %s1721_s24 }
  0x21   : > { %p1717_p11 = scmp.ne.s32.totalorder %s2330_s13, %s1716_s9  ;;  %p1724_p1 = scmp.lt.s32.totalorder %s1722_s18, %s1716_s9 }
  0x22   : > { %1110 = vmatpush1.bf16.msra.mxu1 %v1709_v26 }
  0x23   : > { %1571 = vmatmul.mubr.msk.bf16.vlgmr.msra.gmra.mrb[0].mxu0 %vm491_vm0, %v1689_v11  ;;  %1111 = vmatprep.subr.bf16.mxu1 %v1780_v2  ;;  %v2044_v11 = vld [vmem:[%s2373_s3 + $0x30] sm:$0xff]  ;;  %p1718_p12 = pnand %p1717_p11, %p1867_p5  ;;  %p1725_p2 = por %p1724_p1, %p1723_p0 }
  0x24   : > { %582 = vmatprep.mubr.bf16.mxu0 %v1780_v2 }
  0x25   : > { %p1719_p13 = pneg %p1718_p12 }
  0x26   : > { %1112 = vmatpush1.bf16.msra.mxu1 %v1710_v28 }
  0x27   : > { %1113 = vmatprep.subr.bf16.mxu1 %v1780_v2  ;;  %p1726_p3 = pnand %p1725_p2, %p1719_p13 }
  0x2a   : > { %1114 = vmatpush1.bf16.msra.mxu1 %v1711_v29 }
  0x2b   : > { %1572 = vmatmul.mubr.msk.bf16.gmra.mrb[4].mxu0 %vm491_vm0, %v1690_v14  ;;  %1115 = vmatprep.subr.bf16.mxu1 %v1780_v2 }
  0x2c   : > { %592 = vmatprep.mubr.bf16.mxu0 %v1780_v2 }
  0x2e   : > { %1116 = vmatpush1.bf16.msra.mxu1 %v1712_v31 }
  0x2f   : > { %1117 = vmatprep.subr.bf16.mxu1 %v1780_v2 }
  0x32   : > { %1118 = vmatpush1.bf16.msra.mxu1 %v1713_v32  ;;  %v2068_v32 = vld [vmem:[%s2373_s3 + $0x40] sm:$0xff] }
  0x33   : > { %1573 = vmatmul.mubr.msk.bf16.gmra.mrb[8].mxu0 %vm491_vm0, %v1691_v17 }
  0x34   : > { %602 = vmatprep.mubr.bf16.mxu0 %v1780_v2 }
  0x3b   : > { %1574 = vmatmul.mubr.msk.bf16.gmra.mrb[12].mxu0 %vm491_vm0, %v1692_v18 }
  0x3c   : > { %612 = vmatprep.mubr.bf16.mxu0 %v1780_v2 }
  0x43   : > { %1575 = vmatmul.mubr.msk.bf16.gmra.mrb[16].mxu0 %vm491_vm0, %v1693_v19 }
  0x44   : > { %622 = vmatprep.mubr.bf16.mxu0 %v1780_v2 }
  0x4b   : > { %1576 = vmatmul.mubr.msk.bf16.gmra.mrb[20].mxu0 %vm491_vm0, %v1694_v20 }
  0x4c   : > { %632 = vmatprep.mubr.bf16.mxu0 %v1780_v2 }
  0x53   : > { %1577 = vmatmul.mubr.msk.bf16.gmra.mrb[24].mxu0 %vm491_vm0, %v1695_v21 }
  0x54   : > { %642 = vmatprep.mubr.bf16.mxu0 %v1780_v2 }
  0x5b   : > { %1578 = vmatmul.mubr.msk.bf16.gmra.mrb[28].mxu0 %vm491_vm0, %v1696_v22 }
  0x5c   : > { %652 = vmatprep.mubr.bf16.mxu0 %v1780_v2 }
  0x63   : > { %1579 = vmatmul.mubr.msk.bf16.gmra.mrb[32].mxu0 %vm491_vm0, %v1697_v23 }
  0x64   : > { %662 = vmatprep.mubr.bf16.mxu0 %v1780_v2 }
  0x6b   : > { %1580 = vmatmul.mubr.msk.bf16.gmra.mrb[36].mxu0 %vm491_vm0, %v1698_v24 }
  0x6c   : > { %672 = vmatprep.mubr.bf16.mxu0 %v1780_v2 }
  0x73   : > { %1581 = vmatmul.mubr.msk.bf16.gmra.mrb[40].mxu0 %vm491_vm0, %v1699_v25 }
  0x74   : > { %682 = vmatprep.mubr.bf16.mxu0 %v1780_v2 }
  0x7b   : > { %1582 = vmatmul.mubr.msk.bf16.gmra.mrb[44].mxu0 %vm491_vm0, %v1700_v27 }
  0x7c   : > { %692 = vmatprep.mubr.bf16.mxu0 %v1780_v2 }
  0x83   : > { %1583 = vmatmul.mubr.msk.bf16.gmra.mrb[48].mxu0 %vm491_vm0, %v1701_v30 }
  0x84   : > { %702 = vmatprep.mubr.bf16.mxu0 %v1780_v2 }
  0x8b   : > { %1584 = vmatmul.mubr.msk.bf16.gmra.mrb[52].mxu0 %vm491_vm0, %v1702_v33 }
  0x8c   : > { %712 = vmatprep.mubr.bf16.mxu0 %v1780_v2 }
  0x93   : > { %1585 = vmatmul.mubr.msk.bf16.gmra.mrb[56].mxu0 %vm491_vm0, %v1703_v34  ;;  %v2073_v34 = vld [vmem:[%s2373_s3 + $0x50] sm:$0xff] }
  0x94   : > { %722 = vmatprep.mubr.bf16.mxu0 %v1780_v2 }
  0x9b   : > { %1586 = vmatmul.mubr.msk.bf16.gmra.mrb[60].mxu0 %vm491_vm0, %v1704_v35 }
  0xf6   : > { %v574_v43 = vpop.f32.mrb[0].mxu0 }
  0xf7   : > { %v575_v44 = vadd.f32 %v574_v43, %v2000_v41  ;;  %v576_v45 = vpop.f32.mrb[1].mxu0 }
  0xf8   : > { %v577_v46 = vadd.f32 %v576_v45, %v2002_v42  ;;  %v578_v47 = vpop.f32.mrb[2].mxu0 }
  0xf9   : > { %v733_v48 = vmax.f32 %v575_v44, 0.0  ;;  %v579_v49 = vadd.f32 %v578_v47, %v2000_v41  ;;  %v580_v50 = vpop.f32.mrb[3].mxu0 }
  0xfa   : > { %v734_v52 = vmax.f32 %v577_v46, 0.0  ;;  %v581_v54 = vadd.f32 %v580_v50, %v2002_v42 }
  0xfb   : > { %v735_v56 = vmax.f32 %v579_v49, 0.0  ;;  %v813_v59 = vmul.f32 %v2010_v51, %v733_v48 }
  0xfc   : > { %v736_v58 = vmax.f32 %v581_v54, 0.0  ;;  %v814_v61 = vmul.f32 %v2021_v55, %v734_v52 }
  0xfd   : > { %v815_v60 = vmul.f32 %v2015_v53, %v735_v56 }
  0xfe   : > { %v816_v62 = vmul.f32 %v2026_v57, %v736_v58  ;;  %v584_v63 = vpop.f32.mrb[4].mxu0 }
  0xff   : > { %v877_v0 = vpack.c.bf16 %v815_v60, %v813_v59  ;;  %v585_v1 = vadd.f32 %v584_v63, %v2000_v41  ;;  %v586_v2 = vpop.f32.mrb[5].mxu0  ;;  %v2103_v63 = vld [vmem:[%s2373_s3 + $0x70] sm:$0xff] }
 0x100   : > { %v878_v3 = vpack.c.bf16 %v816_v62, %v814_v61  ;;  %v587_v4 = vadd.f32 %v586_v2, %v2002_v42  ;;  %v588_v5 = vpop.f32.mrb[6].mxu0  ;;  %v2098_v61 = vld [vmem:[%s2373_s3 + $0x60] sm:$0xff] }
 0x101   : > { %v737_v6 = vmax.f32 %v585_v1, 0.0  ;;  %v589_v7 = vadd.f32 %v588_v5, %v2000_v41  ;;  %v590_v8 = vpop.f32.mrb[7].mxu0  ;;  %v2110_v1 = vld [vmem:[%s2373_s3 + $0x68] sm:$0xff] }
 0x102   : > { %911 = vst.msk [vmem:[#allocation2 + $0x8] sm:$0xff] %vm910_vm1, %v878_v3  ;;  %v738_v10 = vmax.f32 %v587_v4, 0.0  ;;  %v591_v12 = vadd.f32 %v590_v8, %v2002_v42  ;;  %v2115_v3 = vld [vmem:[%s2373_s3 + $0x78] sm:$0xff] }
 0x103   : > { %v739_v14 = vmax.f32 %v589_v7, 0.0  ;;  %v817_v17 = vmul.f32 %v2039_v9, %v737_v6 }
 0x104   : > { %v740_v16 = vmax.f32 %v591_v12, 0.0  ;;  %v818_v19 = vmul.f32 %v2050_v13, %v738_v10 }
 0x105   : > { %v819_v18 = vmul.f32 %v2044_v11, %v739_v14 }
 0x106   : > { %v820_v20 = vmul.f32 %v2055_v15, %v740_v16  ;;  %v594_v21 = vpop.f32.mrb[8].mxu0 }
 0x107   : > { %v879_v22 = vpack.c.bf16 %v819_v18, %v817_v17  ;;  %v595_v23 = vadd.f32 %v594_v21, %v2000_v41  ;;  %v596_v24 = vpop.f32.mrb[9].mxu0 }
 0x108   : > { %v880_v25 = vpack.c.bf16 %v820_v20, %v818_v19  ;;  %v597_v26 = vadd.f32 %v596_v24, %v2002_v42  ;;  %v598_v27 = vpop.f32.mrb[10].mxu0 }
 0x109   : > { %v741_v28 = vmax.f32 %v595_v23, 0.0  ;;  %v599_v29 = vadd.f32 %v598_v27, %v2000_v41  ;;  %v600_v30 = vpop.f32.mrb[11].mxu0  ;;  %v943_v31 = vld [vmem:[#allocation2 + $0x8] sm:$0xff] }
 0x10a   : > { %913 = vst.msk [vmem:[#allocation2 + $0x18] sm:$0xff] %vm910_vm1, %v880_v25  ;;  %v742_v33 = vmax.f32 %v597_v26, 0.0  ;;  %v601_v35 = vadd.f32 %v600_v30, %v2002_v42  ;;  %1597 = vmatprep.mubr.msk.bf16.mxu1 %vm910_vm1, %v943_v31 }
 0x10b   : > { %v743_v37 = vmax.f32 %v599_v29, 0.0  ;;  %1134 = vmatmul.mubr.bf16.vlgmr.msra.gmra.mrb[0].mxu1 %v877_v0  ;;  %v821_v40 = vmul.f32 %v2068_v32, %v741_v28 }
 0x10c   : > { %v744_v39 = vmax.f32 %v601_v35, 0.0  ;;  %v822_v44 = vmul.f32 %v2080_v36, %v742_v33 }
 0x10d   : > { %v823_v43 = vmul.f32 %v2073_v34, %v743_v37 }
 0x10e   : > { %v824_v45 = vmul.f32 %v2085_v38, %v744_v39  ;;  %v604_v46 = vpop.f32.mrb[12].mxu0 }
 0x10f   : > { %v881_v47 = vpack.c.bf16 %v823_v43, %v821_v40  ;;  %v605_v48 = vadd.f32 %v604_v46, %v2000_v41  ;;  %v606_v49 = vpop.f32.mrb[13].mxu0 }
 0x110   : > { %v882_v50 = vpack.c.bf16 %v824_v45, %v822_v44  ;;  %v607_v52 = vadd.f32 %v606_v49, %v2002_v42  ;;  %v608_v54 = vpop.f32.mrb[14].mxu0 }
 0x111   : > { %v745_v56 = vmax.f32 %v605_v48, 0.0  ;;  %v609_v58 = vadd.f32 %v608_v54, %v2000_v41  ;;  %v610_v59 = vpop.f32.mrb[15].mxu0  ;;  %v945_v60 = vld [vmem:[#allocation2 + $0x18] sm:$0xff] }
 0x112   : > { %915 = vst.msk [vmem:[#allocation2 + $0x28] sm:$0xff] %vm910_vm1, %v882_v50  ;;  %v746_v62 = vmax.f32 %v607_v52, 0.0  ;;  %v611_v0 = vadd.f32 %v610_v59, %v2002_v42  ;;  %1598 = vmatprep.mubr.msk.bf16.mxu1 %vm910_vm1, %v945_v60 }
 0x113   : > { %v747_v2 = vmax.f32 %v609_v58, 0.0  ;;  %1142 = vmatmul.mubr.bf16.gmra.mrb[4].mxu1 %v879_v22  ;;  %v825_v5 = vmul.f32 %v2098_v61, %v745_v56 }
 0x114   : > { %v748_v4 = vmax.f32 %v611_v0, 0.0  ;;  %v826_v7 = vmul.f32 %v2110_v1, %v746_v62 }
 0x115   : > { %v827_v6 = vmul.f32 %v2103_v63, %v747_v2 }
 0x116   : > { %v828_v8 = vmul.f32 %v2115_v3, %v748_v4  ;;  %v614_v10 = vpop.f32.mrb[16].mxu0 }
 0x117   : > { %v883_v12 = vpack.c.bf16 %v827_v6, %v825_v5  ;;  %v615_v14 = vadd.f32 %v614_v10, %v2000_v41  ;;  %v616_v16 = vpop.f32.mrb[17].mxu0 }
 0x118   : > { %v884_v17 = vpack.c.bf16 %v828_v8, %v826_v7  ;;  %v617_v18 = vadd.f32 %v616_v16, %v2002_v42  ;;  %v618_v19 = vpop.f32.mrb[18].mxu0 }
 0x119   : > { %v749_v20 = vmax.f32 %v615_v14, 0.0  ;;  %v619_v21 = vadd.f32 %v618_v19, %v2000_v41  ;;  %v620_v22 = vpop.f32.mrb[19].mxu0  ;;  %v947_v23 = vld [vmem:[#allocation2 + $0x28] sm:$0xff] }
 0x11a   : > { %917 = vst.msk [vmem:[#allocation2 + $0x38] sm:$0xff] %vm910_vm1, %v884_v17  ;;  %v750_v24 = vmax.f32 %v617_v18, 0.0  ;;  %v621_v25 = vadd.f32 %v620_v22, %v2002_v42  ;;  %1599 = vmatprep.mubr.msk.bf16.mxu1 %vm910_vm1, %v947_v23 }
 0x11b   : > { %v751_v26 = vmax.f32 %v619_v21, 0.0  ;;  %1150 = vmatmul.mubr.bf16.gmra.mrb[8].mxu1 %v881_v47  ;;  %v829_v28 = vmul.f32 %v2010_v51, %v749_v20 }
 0x11c   : > { %v752_v27 = vmax.f32 %v621_v25, 0.0  ;;  %v830_v30 = vmul.f32 %v2021_v55, %v750_v24 }
 0x11d   : > { %v831_v29 = vmul.f32 %v2015_v53, %v751_v26 }
 0x11e   : > { %v832_v31 = vmul.f32 %v2026_v57, %v752_v27  ;;  %v624_v33 = vpop.f32.mrb[20].mxu0 }
 0x11f   : > { %v885_v35 = vpack.c.bf16 %v831_v29, %v829_v28  ;;  %v625_v37 = vadd.f32 %v624_v33, %v2000_v41  ;;  %v626_v39 = vpop.f32.mrb[21].mxu0 }
 0x120   : > { %v886_v40 = vpack.c.bf16 %v832_v31, %v830_v30  ;;  %v627_v43 = vadd.f32 %v626_v39, %v2002_v42  ;;  %v628_v44 = vpop.f32.mrb[22].mxu0 }
 0x121   : > { %v753_v45 = vmax.f32 %v625_v37, 0.0  ;;  %v629_v46 = vadd.f32 %v628_v44, %v2000_v41  ;;  %v630_v47 = vpop.f32.mrb[23].mxu0  ;;  %v949_v48 = vld [vmem:[#allocation2 + $0x38] sm:$0xff] }
 0x122   : > { %919 = vst.msk [vmem:[#allocation2 + $0x48] sm:$0xff] %vm910_vm1, %v886_v40  ;;  %v754_v49 = vmax.f32 %v627_v43, 0.0  ;;  %v631_v50 = vadd.f32 %v630_v47, %v2002_v42  ;;  %1600 = vmatprep.mubr.msk.bf16.mxu1 %vm910_vm1, %v949_v48 }
 0x123   : > { %v755_v52 = vmax.f32 %v629_v46, 0.0  ;;  %1158 = vmatmul.mubr.bf16.gmra.mrb[12].mxu1 %v883_v12  ;;  %v833_v56 = vmul.f32 %v2039_v9, %v753_v45 }
 0x124   : > { %v756_v54 = vmax.f32 %v631_v50, 0.0  ;;  %v834_v59 = vmul.f32 %v2050_v13, %v754_v49 }
 0x125   : > { %v835_v58 = vmul.f32 %v2044_v11, %v755_v52 }
 0x126   : > { %v836_v60 = vmul.f32 %v2055_v15, %v756_v54  ;;  %v634_v62 = vpop.f32.mrb[24].mxu0 }
 0x127   : > { %v887_v0 = vpack.c.bf16 %v835_v58, %v833_v56  ;;  %v635_v2 = vadd.f32 %v634_v62, %v2000_v41  ;;  %v636_v4 = vpop.f32.mrb[25].mxu0 }
 0x128   : > { %v888_v5 = vpack.c.bf16 %v836_v60, %v834_v59  ;;  %v637_v6 = vadd.f32 %v636_v4, %v2002_v42  ;;  %v638_v7 = vpop.f32.mrb[26].mxu0 }
 0x129   : > { %v757_v8 = vmax.f32 %v635_v2, 0.0  ;;  %v639_v10 = vadd.f32 %v638_v7, %v2000_v41  ;;  %v640_v12 = vpop.f32.mrb[27].mxu0  ;;  %v951_v14 = vld [vmem:[#allocation2 + $0x48] sm:$0xff] }
 0x12a   : > { %921 = vst.msk [vmem:[#allocation2 + $0x58] sm:$0xff] %vm910_vm1, %v888_v5  ;;  %v758_v16 = vmax.f32 %v637_v6, 0.0  ;;  %v641_v17 = vadd.f32 %v640_v12, %v2002_v42  ;;  %1601 = vmatprep.mubr.msk.bf16.mxu1 %vm910_vm1, %v951_v14 }
 0x12b   : > { %v759_v18 = vmax.f32 %v639_v10, 0.0  ;;  %1166 = vmatmul.mubr.bf16.gmra.mrb[16].mxu1 %v885_v35  ;;  %v837_v20 = vmul.f32 %v2068_v32, %v757_v8 }
 0x12c   : > { %v760_v19 = vmax.f32 %v641_v17, 0.0  ;;  %v838_v22 = vmul.f32 %v2080_v36, %v758_v16 }
 0x12d   : > { %v839_v21 = vmul.f32 %v2073_v34, %v759_v18 }
 0x12e   : > { %v840_v23 = vmul.f32 %v2085_v38, %v760_v19  ;;  %v644_v24 = vpop.f32.mrb[28].mxu0 }
 0x12f   : > { %v889_v25 = vpack.c.bf16 %v839_v21, %v837_v20  ;;  %v645_v26 = vadd.f32 %v644_v24, %v2000_v41  ;;  %v646_v27 = vpop.f32.mrb[29].mxu0 }
 0x130   : > { %v890_v28 = vpack.c.bf16 %v840_v23, %v838_v22  ;;  %v647_v29 = vadd.f32 %v646_v27, %v2002_v42  ;;  %v648_v30 = vpop.f32.mrb[30].mxu0 }
 0x131   : > { %v761_v31 = vmax.f32 %v645_v26, 0.0  ;;  %v649_v33 = vadd.f32 %v648_v30, %v2000_v41  ;;  %v650_v35 = vpop.f32.mrb[31].mxu0  ;;  %v953_v37 = vld [vmem:[#allocation2 + $0x58] sm:$0xff] }
 0x132   : > { %923 = vst.msk [vmem:[#allocation2 + $0x68] sm:$0xff] %vm910_vm1, %v890_v28  ;;  %v762_v39 = vmax.f32 %v647_v29, 0.0  ;;  %v651_v40 = vadd.f32 %v650_v35, %v2002_v42  ;;  %1602 = vmatprep.mubr.msk.bf16.mxu1 %vm910_vm1, %v953_v37 }
 0x133   : > { %v763_v43 = vmax.f32 %v649_v33, 0.0  ;;  %1174 = vmatmul.mubr.bf16.gmra.mrb[20].mxu1 %v887_v0  ;;  %v841_v45 = vmul.f32 %v2098_v61, %v761_v31 }
 0x134   : > { %v764_v44 = vmax.f32 %v651_v40, 0.0  ;;  %v842_v47 = vmul.f32 %v2110_v1, %v762_v39 }
 0x135   : > { %v843_v46 = vmul.f32 %v2103_v63, %v763_v43 }
 0x136   : > { %v844_v48 = vmul.f32 %v2115_v3, %v764_v44  ;;  %v654_v49 = vpop.f32.mrb[32].mxu0 }
 0x137   : > { %v891_v50 = vpack.c.bf16 %v843_v46, %v841_v45  ;;  %v655_v52 = vadd.f32 %v654_v49, %v2000_v41  ;;  %v656_v54 = vpop.f32.mrb[33].mxu0 }
 0x138   : > { %v892_v56 = vpack.c.bf16 %v844_v48, %v842_v47  ;;  %v657_v58 = vadd.f32 %v656_v54, %v2002_v42  ;;  %v658_v59 = vpop.f32.mrb[34].mxu0 }
 0x139   : > { %v765_v60 = vmax.f32 %v655_v52, 0.0  ;;  %v659_v62 = vadd.f32 %v658_v59, %v2000_v41  ;;  %v660_v0 = vpop.f32.mrb[35].mxu0  ;;  %v955_v2 = vld [vmem:[#allocation2 + $0x68] sm:$0xff] }
 0x13a   : > { %925 = vst.msk [vmem:[#allocation2 + $0x78] sm:$0xff] %vm910_vm1, %v892_v56  ;;  %v766_v4 = vmax.f32 %v657_v58, 0.0  ;;  %v661_v5 = vadd.f32 %v660_v0, %v2002_v42  ;;  %1603 = vmatprep.mubr.msk.bf16.mxu1 %vm910_vm1, %v955_v2 }
 0x13b   : > { %v767_v6 = vmax.f32 %v659_v62, 0.0  ;;  %1182 = vmatmul.mubr.bf16.gmra.mrb[24].mxu1 %v889_v25  ;;  %v845_v8 = vmul.f32 %v2010_v51, %v765_v60 }
 0x13c   : > { %v768_v7 = vmax.f32 %v661_v5, 0.0  ;;  %v846_v12 = vmul.f32 %v2021_v55, %v766_v4 }
 0x13d   : > { %v847_v10 = vmul.f32 %v2015_v53, %v767_v6 }
 0x13e   : > { %v848_v14 = vmul.f32 %v2026_v57, %v768_v7  ;;  %v664_v16 = vpop.f32.mrb[36].mxu0 }
 0x13f   : > { %v893_v17 = vpack.c.bf16 %v847_v10, %v845_v8  ;;  %v665_v18 = vadd.f32 %v664_v16, %v2000_v41  ;;  %v666_v19 = vpop.f32.mrb[37].mxu0 }
 0x140   : > { %v894_v20 = vpack.c.bf16 %v848_v14, %v846_v12  ;;  %v667_v21 = vadd.f32 %v666_v19, %v2002_v42  ;;  %v668_v22 = vpop.f32.mrb[38].mxu0 }
 0x141   : > { %v769_v23 = vmax.f32 %v665_v18, 0.0  ;;  %v669_v24 = vadd.f32 %v668_v22, %v2000_v41  ;;  %v670_v25 = vpop.f32.mrb[39].mxu0  ;;  %v957_v26 = vld [vmem:[#allocation2 + $0x78] sm:$0xff] }
 0x142   : > { %927 = vst.msk [vmem:[#allocation2 + $0x88] sm:$0xff] %vm910_vm1, %v894_v20  ;;  %v770_v27 = vmax.f32 %v667_v21, 0.0  ;;  %v671_v28 = vadd.f32 %v670_v25, %v2002_v42  ;;  %1604 = vmatprep.mubr.msk.bf16.mxu1 %vm910_vm1, %v957_v26 }
 0x143   : > { %v771_v29 = vmax.f32 %v669_v24, 0.0  ;;  %1190 = vmatmul.mubr.bf16.gmra.mrb[28].mxu1 %v891_v50  ;;  %v849_v31 = vmul.f32 %v2039_v9, %v769_v23 }
 0x144   : > { %v772_v30 = vmax.f32 %v671_v28, 0.0  ;;  %v850_v35 = vmul.f32 %v2050_v13, %v770_v27 }
 0x145   : > { %v851_v33 = vmul.f32 %v2044_v11, %v771_v29 }
 0x146   : > { %v852_v37 = vmul.f32 %v2055_v15, %v772_v30  ;;  %v674_v39 = vpop.f32.mrb[40].mxu0 }
 0x147   : > { %v895_v40 = vpack.c.bf16 %v851_v33, %v849_v31  ;;  %v675_v43 = vadd.f32 %v674_v39, %v2000_v41  ;;  %v676_v44 = vpop.f32.mrb[41].mxu0 }
 0x148   : > { %v896_v45 = vpack.c.bf16 %v852_v37, %v850_v35  ;;  %v677_v46 = vadd.f32 %v676_v44, %v2002_v42  ;;  %v678_v47 = vpop.f32.mrb[42].mxu0 }
 0x149   : > { %v773_v48 = vmax.f32 %v675_v43, 0.0  ;;  %v679_v49 = vadd.f32 %v678_v47, %v2000_v41  ;;  %v680_v50 = vpop.f32.mrb[43].mxu0  ;;  %v959_v52 = vld [vmem:[#allocation2 + $0x88] sm:$0xff] }
 0x14a   : > { %929 = vst.msk [vmem:[#allocation2 + $0x98] sm:$0xff] %vm910_vm1, %v896_v45  ;;  %v774_v54 = vmax.f32 %v677_v46, 0.0  ;;  %v681_v56 = vadd.f32 %v680_v50, %v2002_v42  ;;  %1605 = vmatprep.mubr.msk.bf16.mxu1 %vm910_vm1, %v959_v52 }
 0x14b   : > { %v775_v58 = vmax.f32 %v679_v49, 0.0  ;;  %1198 = vmatmul.mubr.bf16.gmra.mrb[32].mxu1 %v893_v17  ;;  %v853_v60 = vmul.f32 %v2068_v32, %v773_v48 }
 0x14c   : > { %v776_v59 = vmax.f32 %v681_v56, 0.0  ;;  %v854_v0 = vmul.f32 %v2080_v36, %v774_v54 }
 0x14d   : > { %v855_v62 = vmul.f32 %v2073_v34, %v775_v58 }
 0x14e   : > { %v856_v2 = vmul.f32 %v2085_v38, %v776_v59  ;;  %v684_v4 = vpop.f32.mrb[44].mxu0 }
 0x14f   : > { %v897_v5 = vpack.c.bf16 %v855_v62, %v853_v60  ;;  %v685_v6 = vadd.f32 %v684_v4, %v2000_v41  ;;  %v686_v7 = vpop.f32.mrb[45].mxu0 }
 0x150   : > { %v898_v8 = vpack.c.bf16 %v856_v2, %v854_v0  ;;  %v687_v10 = vadd.f32 %v686_v7, %v2002_v42  ;;  %v688_v12 = vpop.f32.mrb[46].mxu0 }
 0x151   : > { %v777_v14 = vmax.f32 %v685_v6, 0.0  ;;  %v689_v16 = vadd.f32 %v688_v12, %v2000_v41  ;;  %v690_v17 = vpop.f32.mrb[47].mxu0  ;;  %v961_v18 = vld [vmem:[#allocation2 + $0x98] sm:$0xff] }
 0x152   : > { %931 = vst.msk [vmem:[#allocation2 + $0xa8] sm:$0xff] %vm910_vm1, %v898_v8  ;;  %v778_v19 = vmax.f32 %v687_v10, 0.0  ;;  %v691_v20 = vadd.f32 %v690_v17, %v2002_v42  ;;  %1606 = vmatprep.mubr.msk.bf16.mxu1 %vm910_vm1, %v961_v18 }
 0x153   : > { %v779_v21 = vmax.f32 %v689_v16, 0.0  ;;  %1206 = vmatmul.mubr.bf16.gmra.mrb[36].mxu1 %v895_v40  ;;  %v857_v23 = vmul.f32 %v2098_v61, %v777_v14 }
 0x154   : > { %v780_v22 = vmax.f32 %v691_v20, 0.0  ;;  %v858_v25 = vmul.f32 %v2110_v1, %v778_v19 }
 0x155   : > { %v859_v24 = vmul.f32 %v2103_v63, %v779_v21 }
 0x156   : > { %v860_v26 = vmul.f32 %v2115_v3, %v780_v22  ;;  %v694_v27 = vpop.f32.mrb[48].mxu0 }
 0x157   : > { %v899_v28 = vpack.c.bf16 %v859_v24, %v857_v23  ;;  %v695_v29 = vadd.f32 %v694_v27, %v2000_v41  ;;  %v696_v30 = vpop.f32.mrb[49].mxu0 }
 0x158   : > { %v900_v31 = vpack.c.bf16 %v860_v26, %v858_v25  ;;  %v697_v33 = vadd.f32 %v696_v30, %v2002_v42  ;;  %v698_v35 = vpop.f32.mrb[50].mxu0 }
 0x159   : > { %v781_v37 = vmax.f32 %v695_v29, 0.0  ;;  %v699_v39 = vadd.f32 %v698_v35, %v2000_v41  ;;  %v700_v40 = vpop.f32.mrb[51].mxu0  ;;  %v963_v43 = vld [vmem:[#allocation2 + $0xa8] sm:$0xff] }
 0x15a   : > { %933 = vst.msk [vmem:[#allocation2 + $0xb8] sm:$0xff] %vm910_vm1, %v900_v31  ;;  %v782_v44 = vmax.f32 %v697_v33, 0.0  ;;  %v701_v45 = vadd.f32 %v700_v40, %v2002_v42  ;;  %1607 = vmatprep.mubr.msk.bf16.mxu1 %vm910_vm1, %v963_v43 }
 0x15b   : > { %v783_v46 = vmax.f32 %v699_v39, 0.0  ;;  %1214 = vmatmul.mubr.bf16.gmra.mrb[40].mxu1 %v897_v5  ;;  %v861_v48 = vmul.f32 %v2010_v51, %v781_v37 }
 0x15c   : > { %v784_v47 = vmax.f32 %v701_v45, 0.0  ;;  %v862_v50 = vmul.f32 %v2021_v55, %v782_v44 }
 0x15d   : > { %v863_v49 = vmul.f32 %v2015_v53, %v783_v46 }
 0x15e   : > { %v864_v52 = vmul.f32 %v2026_v57, %v784_v47  ;;  %v704_v54 = vpop.f32.mrb[52].mxu0 }
 0x15f   : > { %v901_v56 = vpack.c.bf16 %v863_v49, %v861_v48  ;;  %v705_v58 = vadd.f32 %v704_v54, %v2000_v41  ;;  %v706_v59 = vpop.f32.mrb[53].mxu0  ;;  %v1781_v54 = vmov 0.0  }
 0x160   : > { %v902_v60 = vpack.c.bf16 %v864_v52, %v862_v50  ;;  %v707_v62 = vadd.f32 %v706_v59, %v2002_v42  ;;  %v708_v0 = vpop.f32.mrb[54].mxu0  ;;  %v1714_v50 = vld [vmem:[%s2376_s6] sm:$0xff]   ;;  %1624 = vmatprep.subr.bf16.mxu0 %v1781_v54  ;;  %1628 = vmatprep.mubr.msk.bf16.mxu0 %vm1782_vm3, %v1781_v54 }
 0x161   : > { %v785_v2 = vmax.f32 %v705_v58, 0.0  ;;  %v709_v4 = vadd.f32 %v708_v0, %v2000_v41  ;;  %v710_v5 = vpop.f32.mrb[55].mxu0  ;;  %v965_v51 = vld [vmem:[#allocation2 + $0xb8] sm:$0xff]  ;;  %1625 = vmatpush3.bf16.msra.mxu0 %v1714_v50 }
 0x162   : > { %935 = vst.msk [vmem:[#allocation2 + $0xc8] sm:$0xff] %vm910_vm1, %v902_v60  ;;  %v786_v53 = vmax.f32 %v707_v62, 0.0  ;;  %v711_v55 = vadd.f32 %v710_v5, %v2002_v42  ;;  %1608 = vmatprep.mubr.msk.bf16.mxu1 %vm910_vm1, %v965_v51  ;;  %1626 = vmatprep.subr.bf16.mxu0 %v1781_v54 }
 0x163   : > { %v787_v57 = vmax.f32 %v709_v4, 0.0  ;;  %1222 = vmatmul.mubr.bf16.gmra.mrb[44].mxu1 %v899_v28  ;;  %v865_v7 = vmul.f32 %v2039_v9, %v785_v2 }
 0x164   : > { %v788_v6 = vmax.f32 %v711_v55, 0.0  ;;  %v866_v10 = vmul.f32 %v2050_v13, %v786_v53 }
 0x165   : > { %v867_v8 = vmul.f32 %v2044_v11, %v787_v57 }
 0x166   : > { %v868_v12 = vmul.f32 %v2055_v15, %v788_v6  ;;  %v714_v14 = vpop.f32.mrb[56].mxu0 }
 0x167   : > { %v903_v16 = vpack.c.bf16 %v867_v8, %v865_v7  ;;  %v715_v17 = vadd.f32 %v714_v14, %v2000_v41  ;;  %v716_v18 = vpop.f32.mrb[57].mxu0 }
 0x168   : > { %v904_v19 = vpack.c.bf16 %v868_v12, %v866_v10  ;;  %v717_v20 = vadd.f32 %v716_v18, %v2002_v42  ;;  %v718_v21 = vpop.f32.mrb[58].mxu0 }
 0x169   : > { %v789_v22 = vmax.f32 %v715_v17, 0.0  ;;  %v719_v23 = vadd.f32 %v718_v21, %v2000_v41  ;;  %v720_v24 = vpop.f32.mrb[59].mxu0  ;;  %v967_v9 = vld [vmem:[#allocation2 + $0xc8] sm:$0xff] }
 0x16a   : > { %937 = vst.msk [vmem:[#allocation2 + $0xd8] sm:$0xff] %vm910_vm1, %v904_v19  ;;  %v790_v11 = vmax.f32 %v717_v20, 0.0  ;;  %v721_v13 = vadd.f32 %v720_v24, %v2002_v42  ;;  %1609 = vmatprep.mubr.msk.bf16.mxu1 %vm910_vm1, %v967_v9 }
 0x16b   : > { %v791_v15 = vmax.f32 %v719_v23, 0.0  ;;  %1230 = vmatmul.mubr.bf16.gmra.mrb[48].mxu1 %v901_v56  ;;  %v869_v26 = vmul.f32 %v2068_v32, %v789_v22 }
 0x16c   : > { %v792_v25 = vmax.f32 %v721_v13, 0.0  ;;  %v870_v28 = vmul.f32 %v2080_v36, %v790_v11 }
 0x16d   : > { %v871_v27 = vmul.f32 %v2073_v34, %v791_v15 }
 0x16e   : > { %v872_v29 = vmul.f32 %v2085_v38, %v792_v25  ;;  %v724_v30 = vpop.f32.mrb[60].mxu0 }
 0x16f   : > { %v905_v31 = vpack.c.bf16 %v871_v27, %v869_v26  ;;  %v725_v33 = vadd.f32 %v724_v30, %v2000_v41  ;;  %v726_v35 = vpop.f32.mrb[61].mxu0 }
 0x170   : > { %v906_v37 = vpack.c.bf16 %v872_v29, %v870_v28  ;;  %v727_v39 = vadd.f32 %v726_v35, %v2002_v42  ;;  %v728_v40 = vpop.f32.mrb[62].mxu0 }
 0x171   : > { %v793_v43 = vmax.f32 %v725_v33, 0.0  ;;  %v729_v44 = vadd.f32 %v728_v40, %v2000_v41  ;;  %v730_v45 = vpop.f32.mrb[63].mxu0  ;;  %v969_v32 = vld [vmem:[#allocation2 + $0xd8] sm:$0xff] }
 0x172   : > { %939 = vst.msk [vmem:[#allocation2 + $0xe8] sm:$0xff] %vm910_vm1, %v906_v37  ;;  %v794_v34 = vmax.f32 %v727_v39, 0.0  ;;  %v731_v36 = vadd.f32 %v730_v45, %v2002_v42  ;;  %1610 = vmatprep.mubr.msk.bf16.mxu1 %vm910_vm1, %v969_v32 }
 0x173   : > { %v795_v38 = vmax.f32 %v729_v44, 0.0  ;;  %1238 = vmatmul.mubr.bf16.gmra.mrb[52].mxu1 %v903_v16  ;;  %v873_v47 = vmul.f32 %v2098_v61, %v793_v43 }
 0x174   : > { %v796_v46 = vmax.f32 %v731_v36, 0.0  ;;  %v874_v49 = vmul.f32 %v2110_v1, %v794_v34  ;;  %v2253_v1 = vld [vmem:[%s2375_s5] ss:$0 sm:$0xff] }
 0x175   : > { %v875_v48 = vmul.f32 %v2103_v63, %v795_v38  ;;  %v1715_v63 = vld [vmem:[%s2376_s6 + $0x8] sm:$0xff]  }
 0x176   : > { %v876_v41 = vmul.f32 %v2115_v3, %v796_v46  ;;  %1627 = vmatpush3.bf16.msra.mxu0 %v1715_v63 }
 0x177   : > { %v907_v52 = vpack.c.bf16 %v875_v48, %v873_v47 }
 0x178   : > { %v908_v42 = vpack.c.bf16 %v876_v41, %v874_v49 }
 0x179   : > { %v971_v56 = vld [vmem:[#allocation2 + $0xe8] sm:$0xff] }
 0x17a   : > { %941 = vst.msk [vmem:[#allocation2 + $0xf8] sm:$0xff] %vm910_vm1, %v908_v42  ;;  %1611 = vmatprep.mubr.msk.bf16.mxu1 %vm910_vm1, %v971_v56 }
 0x17b   : > { %1246 = vmatmul.mubr.bf16.gmra.mrb[56].mxu1 %v905_v31 }
 0x181   : > { %v973_v61 = vld [vmem:[#allocation2 + $0xf8] sm:$0xff] }
 0x182   : > { %1612 = vmatprep.mubr.msk.bf16.mxu1 %vm910_vm1, %v973_v61 }
 0x183   : > { %1254 = vmatmul.mubr.bf16.gmra.mrb[60].mxu1 %v907_v52 }
 0x1de   : > { %v1135_v3 = vpop.f32.mrb[0].mxu1 }
 0x1df   : > { %v1136_v58 = vadd.f32 %v2253_v1, %v1135_v3  ;;  %v1137_v59 = vpop.f32.mrb[1].mxu1 }
 0x1e0   : > { %v1138_v60 = vpop.f32.mrb[2].mxu1 }
 0x1e1   : > { %v1262_v62 = vmax.f32 %v1136_v58, 0.0  ;;  %v1139_v0 = vadd.f32 %v2253_v1, %v1138_v60  ;;  %v1140_v2 = vpop.f32.mrb[3].mxu1 }
 0x1e3   : > { %v1263_v4 = vmax.f32 %v1139_v0, 0.0  ;;  %v1295_v5 = vsel %vm1294_vm2, %v1262_v62, 0.0 }
 0x1e5   : > { %v1296_v51 = vsel %vm1294_vm2, %v1263_v4, 0.0 }
 0x1e6   : > { %v1297_v53 = vadd.f32 %v1296_v51, %v1295_v5  ;;  %v1143_v55 = vpop.f32.mrb[4].mxu1 }
 0x1e7   : > { %v1144_v57 = vadd.f32 %v2253_v1, %v1143_v55  ;;  %v1145_v6 = vpop.f32.mrb[5].mxu1 }
 0x1e8   : > { %v1146_v7 = vpop.f32.mrb[6].mxu1 }
 0x1e9   : > { %v1264_v8 = vmax.f32 %v1144_v57, 0.0  ;;  %v1147_v10 = vadd.f32 %v2253_v1, %v1146_v7  ;;  %v1148_v12 = vpop.f32.mrb[7].mxu1 }
 0x1eb   : > { %v1298_v14 = vsel %vm1294_vm2, %v1264_v8, 0.0  ;;  %v1265_v16 = vmax.f32 %v1147_v10, 0.0 }
 0x1ec   : > { %v1299_v17 = vadd.f32 %v1298_v14, %v1297_v53 }
 0x1ed   : > { %v1300_v18 = vsel %vm1294_vm2, %v1265_v16, 0.0 }
 0x1ee   : > { %v1301_v19 = vadd.f32 %v1300_v18, %v1299_v17  ;;  %v1151_v20 = vpop.f32.mrb[8].mxu1 }
 0x1ef   : > { %v1152_v21 = vadd.f32 %v2253_v1, %v1151_v20  ;;  %v1153_v22 = vpop.f32.mrb[9].mxu1 }
 0x1f0   : > { %v1154_v23 = vpop.f32.mrb[10].mxu1 }
 0x1f1   : > { %v1266_v24 = vmax.f32 %v1152_v21, 0.0  ;;  %v1155_v9 = vadd.f32 %v2253_v1, %v1154_v23  ;;  %v1156_v11 = vpop.f32.mrb[11].mxu1 }
 0x1f3   : > { %v1302_v13 = vsel %vm1294_vm2, %v1266_v24, 0.0  ;;  %v1267_v15 = vmax.f32 %v1155_v9, 0.0 }
 0x1f4   : > { %v1303_v25 = vadd.f32 %v1302_v13, %v1301_v19 }
 0x1f5   : > { %v1304_v26 = vsel %vm1294_vm2, %v1267_v15, 0.0 }
 0x1f6   : > { %v1305_v27 = vadd.f32 %v1304_v26, %v1303_v25  ;;  %v1159_v28 = vpop.f32.mrb[12].mxu1 }
 0x1f7   : > { %v1160_v29 = vadd.f32 %v2253_v1, %v1159_v28  ;;  %v1161_v30 = vpop.f32.mrb[13].mxu1 }
 0x1f8   : > { %v1162_v31 = vpop.f32.mrb[14].mxu1 }
 0x1f9   : > { %v1268_v33 = vmax.f32 %v1160_v29, 0.0  ;;  %v1163_v35 = vadd.f32 %v2253_v1, %v1162_v31  ;;  %v1164_v37 = vpop.f32.mrb[15].mxu1 }
 0x1fb   : > { %v1306_v39 = vsel %vm1294_vm2, %v1268_v33, 0.0  ;;  %v1269_v40 = vmax.f32 %v1163_v35, 0.0 }
 0x1fc   : > { %v1307_v43 = vadd.f32 %v1306_v39, %v1305_v27 }
 0x1fd   : > { %v1308_v44 = vsel %vm1294_vm2, %v1269_v40, 0.0 }
 0x1fe   : > { %v1309_v45 = vadd.f32 %v1308_v44, %v1307_v43  ;;  %v1167_v32 = vpop.f32.mrb[16].mxu1 }
 0x1ff   : > { %v1168_v34 = vadd.f32 %v2253_v1, %v1167_v32  ;;  %v1169_v36 = vpop.f32.mrb[17].mxu1 }
 0x200   : > { %v1170_v38 = vpop.f32.mrb[18].mxu1  ;;  %v1310_v7 = vrot.slane %v1309_v45, 4 }
 0x201   : > { %v1270_v46 = vmax.f32 %v1168_v34, 0.0  ;;  %v1171_v47 = vadd.f32 %v2253_v1, %v1170_v38  ;;  %v1172_v48 = vpop.f32.mrb[19].mxu1 }
 0x202   : > { %v1311_v16 = vadd.f32 %v1310_v7, %v1309_v45 }
 0x203   : > { %v1271_v49 = vmax.f32 %v1171_v47, 0.0  ;;  %v1316_v41 = vsel %vm1294_vm2, %v1270_v46, 0.0 }
 0x204   : > { %v1312_v9 = vrot.slane %v1311_v16, 2 }
 0x205   : > { %v1317_v50 = vsel %vm1294_vm2, %v1271_v49, 0.0 }
 0x206   : > { %v1318_v52 = vadd.f32 %v1317_v50, %v1316_v41  ;;  %v1175_v54 = vpop.f32.mrb[20].mxu1  ;;  %v1313_v26 = vadd.f32 %v1312_v9, %v1311_v16 }
 0x207   : > { %v1176_v42 = vadd.f32 %v2253_v1, %v1175_v54  ;;  %v1177_v56 = vpop.f32.mrb[21].mxu1 }
 0x208   : > { %v1178_v61 = vpop.f32.mrb[22].mxu1  ;;  %v1314_v40 = vrot.slane %v1313_v26, 1 }
 0x209   : > { %v1272_v63 = vmax.f32 %v1176_v42, 0.0  ;;  %v1179_v3 = vadd.f32 %v2253_v1, %v1178_v61  ;;  %v1180_v58 = vpop.f32.mrb[23].mxu1 }
 0x20a   : > { %v1315_v36 = vadd.f32 %v1314_v40, %v1313_v26 }
 0x20b   : > { %v1319_v59 = vsel %vm1294_vm2, %v1272_v63, 0.0  ;;  %v1273_v60 = vmax.f32 %v1179_v3, 0.0 }
 0x20c   : > { %v1320_v62 = vadd.f32 %v1319_v59, %v1318_v52  ;;  %v1379_v56 = vpack.c.bf16 %v1315_v36, %v1315_v36 }
 0x20d   : > { %v1321_v0 = vsel %vm1294_vm2, %v1273_v60, 0.0 }
 0x20e   : > { %v1322_v2 = vadd.f32 %v1321_v0, %v1320_v62  ;;  %v1183_v4 = vpop.f32.mrb[24].mxu1  ;;  %v1398_v62 = vunpack.c.l.b16 %v1379_v56 }
 0x20f   : > { %v1184_v5 = vadd.f32 %v2253_v1, %v1183_v4  ;;  %v1185_v51 = vpop.f32.mrb[25].mxu1 }
 0x210   : > { %v1186_v53 = vpop.f32.mrb[26].mxu1 }
 0x211   : > { %v1274_v55 = vmax.f32 %v1184_v5, 0.0  ;;  %v1187_v57 = vadd.f32 %v2253_v1, %v1186_v53  ;;  %v1188_v6 = vpop.f32.mrb[27].mxu1 }
 0x213   : > { %v1323_v8 = vsel %vm1294_vm2, %v1274_v55, 0.0  ;;  %v1275_v10 = vmax.f32 %v1187_v57, 0.0 }
 0x214   : > { %v1324_v12 = vadd.f32 %v1323_v8, %v1322_v2 }
 0x215   : > { %v1325_v14 = vsel %vm1294_vm2, %v1275_v10, 0.0 }
 0x216   : > { %v1326_v17 = vadd.f32 %v1325_v14, %v1324_v12  ;;  %v1191_v18 = vpop.f32.mrb[28].mxu1 }
 0x217   : > { %v1192_v19 = vadd.f32 %v2253_v1, %v1191_v18  ;;  %v1193_v20 = vpop.f32.mrb[29].mxu1 }
 0x218   : > { %v1194_v21 = vpop.f32.mrb[30].mxu1 }
 0x219   : > { %v1276_v22 = vmax.f32 %v1192_v19, 0.0  ;;  %v1195_v23 = vadd.f32 %v2253_v1, %v1194_v21  ;;  %v1196_v24 = vpop.f32.mrb[31].mxu1 }
 0x21b   : > { %v1327_v11 = vsel %vm1294_vm2, %v1276_v22, 0.0  ;;  %v1277_v13 = vmax.f32 %v1195_v23, 0.0 }
 0x21c   : > { %v1328_v15 = vadd.f32 %v1327_v11, %v1326_v17 }
 0x21d   : > { %v1329_v25 = vsel %vm1294_vm2, %v1277_v13, 0.0 }
 0x21e   : > { %v1330_v27 = vadd.f32 %v1329_v25, %v1328_v15  ;;  %v1199_v28 = vpop.f32.mrb[32].mxu1 }
 0x21f   : > { %v1200_v29 = vadd.f32 %v2253_v1, %v1199_v28  ;;  %v1201_v30 = vpop.f32.mrb[33].mxu1 }
 0x220   : > { %v1331_v31 = vrot.slane %v1330_v27, 4  ;;  %v1202_v33 = vpop.f32.mrb[34].mxu1 }
 0x221   : > { %v1278_v35 = vmax.f32 %v1200_v29, 0.0  ;;  %v1203_v37 = vadd.f32 %v2253_v1, %v1202_v33  ;;  %v1204_v39 = vpop.f32.mrb[35].mxu1 }
 0x222   : > { %v1332_v43 = vadd.f32 %v1331_v31, %v1330_v27 }
 0x223   : > { %v1279_v44 = vmax.f32 %v1203_v37, 0.0  ;;  %v1337_v32 = vsel %vm1294_vm2, %v1278_v35, 0.0 }
 0x224   : > { %v1333_v45 = vrot.slane %v1332_v43, 2 }
 0x225   : > { %v1338_v34 = vsel %vm1294_vm2, %v1279_v44, 0.0 }
 0x226   : > { %v1334_v38 = vadd.f32 %v1333_v45, %v1332_v43  ;;  %v1339_v46 = vadd.f32 %v1338_v34, %v1337_v32  ;;  %v1207_v47 = vpop.f32.mrb[36].mxu1 }
 0x227   : > { %v1208_v48 = vadd.f32 %v2253_v1, %v1207_v47  ;;  %v1209_v49 = vpop.f32.mrb[37].mxu1 }
 0x228   : > { %v1335_v41 = vrot.slane %v1334_v38, 1  ;;  %v1210_v50 = vpop.f32.mrb[38].mxu1 }
 0x229   : > { %v1280_v52 = vmax.f32 %v1208_v48, 0.0  ;;  %v1211_v54 = vadd.f32 %v2253_v1, %v1210_v50  ;;  %v1212_v42 = vpop.f32.mrb[39].mxu1 }
 0x22a   : > { %v1336_v61 = vadd.f32 %v1335_v41, %v1334_v38 }
 0x22b   : > { %v1340_v63 = vsel %vm1294_vm2, %v1280_v52, 0.0  ;;  %v1281_v3 = vmax.f32 %v1211_v54, 0.0 }
 0x22c   : > { %v1380_v58 = vpack.c.bf16 %v1336_v61, %v1336_v61  ;;  %v1341_v59 = vadd.f32 %v1340_v63, %v1339_v46 }
 0x22d   : > { %v1342_v60 = vsel %vm1294_vm2, %v1281_v3, 0.0 }
 0x22e   : > { %v1399_v0 = vunpack.c.l.b16 %v1380_v58  ;;  %v1343_v2 = vadd.f32 %v1342_v60, %v1341_v59  ;;  %v1215_v4 = vpop.f32.mrb[40].mxu1 }
 0x22f   : > { %v1216_v5 = vadd.f32 %v2253_v1, %v1215_v4  ;;  %v1217_v51 = vpop.f32.mrb[41].mxu1 }
 0x230   : > { %v1403_v53 = vsel %vm1402_vm4, %v1399_v0, %v1398_v62  ;;  %v1218_v55 = vpop.f32.mrb[42].mxu1 }
 0x231   : > { %v1282_v57 = vmax.f32 %v1216_v5, 0.0  ;;  %v1219_v6 = vadd.f32 %v2253_v1, %v1218_v55  ;;  %v1220_v7 = vpop.f32.mrb[43].mxu1 }
 0x233   : > { %v1344_v8 = vsel %vm1294_vm2, %v1282_v57, 0.0  ;;  %v1283_v10 = vmax.f32 %v1219_v6, 0.0 }
 0x234   : > { %v1345_v12 = vadd.f32 %v1344_v8, %v1343_v2 }
 0x235   : > { %v1346_v14 = vsel %vm1294_vm2, %v1283_v10, 0.0 }
 0x236   : > { %v1347_v16 = vadd.f32 %v1346_v14, %v1345_v12  ;;  %v1223_v17 = vpop.f32.mrb[44].mxu1 }
 0x237   : > { %v1224_v18 = vadd.f32 %v2253_v1, %v1223_v17  ;;  %v1225_v19 = vpop.f32.mrb[45].mxu1 }
 0x238   : > { %v1226_v20 = vpop.f32.mrb[46].mxu1 }
 0x239   : > { %v1284_v21 = vmax.f32 %v1224_v18, 0.0  ;;  %v1227_v22 = vadd.f32 %v2253_v1, %v1226_v20  ;;  %v1228_v23 = vpop.f32.mrb[47].mxu1 }
 0x23b   : > { %v1348_v24 = vsel %vm1294_vm2, %v1284_v21, 0.0  ;;  %v1285_v9 = vmax.f32 %v1227_v22, 0.0 }
 0x23c   : > { %v1349_v11 = vadd.f32 %v1348_v24, %v1347_v16 }
 0x23d   : > { %v1350_v13 = vsel %vm1294_vm2, %v1285_v9, 0.0 }
 0x23e   : > { %v1351_v15 = vadd.f32 %v1350_v13, %v1349_v11  ;;  %v1231_v25 = vpop.f32.mrb[48].mxu1 }
 0x23f   : > { %v1232_v26 = vadd.f32 %v2253_v1, %v1231_v25  ;;  %v1233_v27 = vpop.f32.mrb[49].mxu1 }
 0x240   : > { %v1352_v28 = vrot.slane %v1351_v15, 4  ;;  %v1234_v29 = vpop.f32.mrb[50].mxu1  ;;  %v1613_v27 = vld [vmem:[%s2377_s7] ss:$0 sm:$0xff] }
 0x241   : > { %v1286_v30 = vmax.f32 %v1232_v26, 0.0  ;;  %v1235_v31 = vadd.f32 %v2253_v1, %v1234_v29  ;;  %v1236_v33 = vpop.f32.mrb[51].mxu1 }
 0x242   : > { %v1353_v35 = vadd.f32 %v1352_v28, %v1351_v15 }
 0x243   : > { %v1287_v37 = vmax.f32 %v1235_v31, 0.0  ;;  %v1358_v40 = vsel %vm1294_vm2, %v1286_v30, 0.0 }
 0x244   : > { %v1354_v39 = vrot.slane %v1353_v35, 2 }
 0x245   : > { %v1359_v43 = vsel %vm1294_vm2, %v1287_v37, 0.0 }
 0x246   : > { %v1355_v44 = vadd.f32 %v1354_v39, %v1353_v35  ;;  %v1360_v45 = vadd.f32 %v1359_v43, %v1358_v40  ;;  %v1239_v32 = vpop.f32.mrb[52].mxu1 }
 0x247   : > { %v1240_v34 = vadd.f32 %v2253_v1, %v1239_v32  ;;  %v1241_v36 = vpop.f32.mrb[53].mxu1 }
 0x248   : > { %v1356_v38 = vrot.slane %v1355_v44, 1  ;;  %v1242_v46 = vpop.f32.mrb[54].mxu1 }
 0x249   : > { %v1288_v47 = vmax.f32 %v1240_v34, 0.0  ;;  %v1243_v48 = vadd.f32 %v2253_v1, %v1242_v46  ;;  %v1244_v49 = vpop.f32.mrb[55].mxu1 }
 0x24a   : > { %v1357_v41 = vadd.f32 %v1356_v38, %v1355_v44 }
 0x24b   : > { %v1361_v50 = vsel %vm1294_vm2, %v1288_v47, 0.0  ;;  %v1289_v52 = vmax.f32 %v1243_v48, 0.0 }
 0x24c   : > { %v1381_v54 = vpack.c.bf16 %v1357_v41, %v1357_v41  ;;  %v1362_v42 = vadd.f32 %v1361_v50, %v1360_v45 }
 0x24d   : > { %v1363_v56 = vsel %vm1294_vm2, %v1289_v52, 0.0 }
 0x24e   : > { %v1400_v61 = vunpack.c.l.b16 %v1381_v54  ;;  %v1364_v63 = vadd.f32 %v1363_v56, %v1362_v42  ;;  %v1247_v3 = vpop.f32.mrb[56].mxu1 }
 0x24f   : > { %v1248_v58 = vadd.f32 %v2253_v1, %v1247_v3  ;;  %v1249_v59 = vpop.f32.mrb[57].mxu1 }
 0x250   : > { %v1405_v60 = vsel %vm1404_vm5, %v1400_v61, %v1403_v53  ;;  %v1250_v62 = vpop.f32.mrb[58].mxu1 }
 0x251   : > { %v1290_v0 = vmax.f32 %v1248_v58, 0.0  ;;  %v1251_v2 = vadd.f32 %v2253_v1, %v1250_v62  ;;  %v1252_v4 = vpop.f32.mrb[59].mxu1 }
 0x253   : > { %v1365_v5 = vsel %vm1294_vm2, %v1290_v0, 0.0  ;;  %v1291_v51 = vmax.f32 %v1251_v2, 0.0 }
 0x254   : > { %v1366_v55 = vadd.f32 %v1365_v5, %v1364_v63 }
 0x255   : > { %v1367_v57 = vsel %vm1294_vm2, %v1291_v51, 0.0 }
 0x256   : > { %v1368_v6 = vadd.f32 %v1367_v57, %v1366_v55  ;;  %v1255_v7 = vpop.f32.mrb[60].mxu1 }
 0x257   : > { %v1256_v8 = vadd.f32 %v2253_v1, %v1255_v7  ;;  %v1257_v10 = vpop.f32.mrb[61].mxu1 }
 0x258   : > { %v1258_v12 = vpop.f32.mrb[62].mxu1 }
 0x259   : > { %v1292_v14 = vmax.f32 %v1256_v8, 0.0  ;;  %v1259_v53 = vadd.f32 %v2253_v1, %v1258_v12  ;;  %v1260_v16 = vpop.f32.mrb[63].mxu1 }
 0x25b   : > { %v1369_v17 = vsel %vm1294_vm2, %v1292_v14, 0.0  ;;  %v1293_v18 = vmax.f32 %v1259_v53, 0.0 }
 0x25c   : > { %v1370_v19 = vadd.f32 %v1369_v17, %v1368_v6 }
 0x25d   : > { %v1371_v20 = vsel %vm1294_vm2, %v1293_v18, 0.0 }
 0x25e   : > { %v1372_v21 = vadd.f32 %v1371_v20, %v1370_v19 }
 0x260   : > { %v1373_v22 = vrot.slane %v1372_v21, 4 }
 0x262   : > { %v1374_v23 = vadd.f32 %v1373_v22, %v1372_v21 }
 0x264   : > { %v1375_v24 = vrot.slane %v1374_v23, 2 }
 0x266   : > { %v1376_v9 = vadd.f32 %v1375_v24, %v1374_v23 }
 0x268   : > { %v1377_v11 = vrot.slane %v1376_v9, 1 }
 0x26a   : > { %v1378_v13 = vadd.f32 %v1377_v11, %v1376_v9 }
 0x26c   : > { %v1382_v15 = vpack.c.bf16 %v1378_v13, %v1378_v13 }
 0x26e   : > { %v1401_v25 = vunpack.c.l.b16 %v1382_v15 }
 0x270   : > { %v1407_v1 = vsel %vm1406_vm6, %v1401_v25, %v1405_v60 }
 0x271   : > { %v1408_v26 = vpack.c.b16 %v1407_v1, %v1407_v1 }
 0x273   : > { %1629 = vmatmul.mubr.msk.bf16.vlgmr.msra.gmra.mrb[64].mxu0 %vm1294_vm2, %v1408_v26 }
 0x346   : > { %v1458_v28 = vpop.f32.mrb[64].mxu0 }
 0x347   : > { %v1459_v29 = vadd.f32 %v1613_v27, %v1458_v28  ;;  %v1630_v30 = vpop.f32.mrb[65].mxu0 }
 0x348   : > { %v1461_v31 = vpop.f32.mrb[66].mxu0 }
 0x349   : > { %1464 = vst [vmem:[%s299_s12] sm:$0xf] %v1459_v29  ;;  %v1631_v33 = vpop.f32.mrb[67].mxu0 }
 0x34a   : > { %1729 = shalt.err (!%p1726_p3)
}
 0x34b   : > { %s1730_s19 = scalar_lea.hbm %s2328_s21, 64  ;;  %s1734_s10 = scalar_lea.hbm %s2378_s8, 128 }
 0x34c   : > { %p1731_p4 = scmp.ne.s32.totalorder %s2328_s21, %s1730_s19  ;;  %p1735_p9 = scmp.lt.u32.totalorder %s2328_s21, %s2378_s8 }
 0x34d   : > { %p1736_p10 = scmp.lt.u32.totalorder %s1734_s10, %s1730_s19  ;;  %p1738_p12 = scmp.lt.u32.totalorder %s1730_s19, %s2328_s21 }
 0x34e   : > { %p1732_p7 = pnand %p1731_p4, %p1867_p5 }
 0x34f   : > { %p1737_p11 = por %p1736_p10, %p1735_p9 }
 0x350   : > { %p1733_p8 = pneg %p1732_p7 }
 0x351   : > { %p1739_p13 = por %p1738_p12, %p1737_p11 }
 0x353   : > { %p1740_p0 = pnand %p1739_p13, %p1733_p8 }
 0x355   : > { %1743 = shalt.err (!%p1740_p0)
}
 0x356   : > { %1632 = dma.vmem_to_hbm [thread:$0]  (%p1867_p5), %s2330_s13, 64, %s2328_s21, %s1466_s22  }
 0x357 PF: > { %p1638_p1 = scmp.ge.s32.totalorder %s1778_s30, 2  ;;  %s1491_s20 = sand.u32 1, %s1766_s27  }
 0x358   : > { %s1492_s9 = scalar_lea.sflag [#allocation4], %s1491_s20 }
 0x359   : > { %p1635_p2 = pnand %p1638_p1, %p1871_p6 }
 0x35b   : > { %1761 = dma.done.wait (!%p1635_p2), %s1492_s9, 64  }
 0x35c   : > { %1763 = vsyncadd (!%p1635_p2), %s1492_s9, 4294967232  ;;  %p18_p3 = scmp.ge.s32.totalorder %s1854_s11, 4   ;;  %s2381_s27 = smov %s1770_s28 }
 0x35d   : > { %s2382_s28 = smov %s1774_s29  ;;  %s2383_s29 = smov %s1865_s14 }
 0x35e   : > { %s2384_s30 = smov %s1854_s11  ;;  %20 = sbr.rel (!%p18_p3) target bundleno = 3 (0x3), region = 87 }
 0x365   :  { %1497 = vsyncpa [#allocation4], 1 }
 0x366   :  { %1499 = vsyncpa [#allocation4 + $0x1], 1 }

</bundles_post_ra>
